<compile_context>
chip_gen: v7x
topology: tpu7x:2x2x1
jax: 0.10.0
libtpu: 0.0.40
codegen_flags: <defaults>
</compile_context>

<pallas_src>
import functools

import jax
import jax.numpy as jnp
from jax import lax
from jax.experimental import pallas as pl
from jax.experimental.pallas import tpu as pltpu


# ----------------------------- small helpers ---------------------------------

def _apply_act(y, act):
    if act == "relu":
        return jnp.maximum(y, 0.0)
    if act == "hard_swish":
        return y * (jnp.clip(y + 3.0, 0.0, 6.0) * (1.0 / 6.0))
    return y  # act is None


def _round_up(x, m):
    return ((x + m - 1) // m) * m


def _vmem_limit_bytes():
    """Scoped-VMEM limit: ~75% of physical VMEM, conservative 48 MiB fallback."""
    cap = 64 * 1024 * 1024  # v7x physical size: safe lower bound everywhere
    try:
        info = pltpu.get_tpu_info()
        c = getattr(info, "vmem_capacity_bytes", None)
        if c:
            cap = int(c)
    except Exception:
        pass
    return int(min(cap * 3 // 4, 96 * 1024 * 1024))


def _pick_strip(rows, cols, cap=1024):
    """Largest divisor of `rows` keeping a (strip, cols) slab <= `cap` elements."""
    best = 1
    for t in range(1, rows + 1):
        if rows % t == 0 and t * cols <= cap:
            best = t
    return best


def _pick_channel_tile(cexp, cin, h, w, k, stride, y_bytes, budget):
    """Channel tile for K1: ct == cexp or ct % 128 == 0, sized for the VMEM budget.

    The estimate includes double-buffered input/weight/output blocks, the padded
    halo scratch and the per-strip live temporaries.
    """
    p = (k - 1) // 2
    ho = (h - 1) // stride + 1
    wo = (w - 1) // stride + 1
    hp = h + 2 * p
    col_start = _round_up(p, 8)
    wpad = _round_up(col_start + w + p, 8)
    fixed = 2 * h * w * cin * 4                        # double-buffered input block
    cands = {cexp}
    c = 128
    while c < cexp:
        if cexp % c == 0:
            cands.add(c)
        c += 128
    for c in sorted(cands, reverse=True):
        est = (fixed
               + hp * wpad * c * 4                     # halo scratch (f32)
               + 2 * ho * wo * c * y_bytes             # y output block (dbl-buffered)
               + 2 * (cin * 2 + k * k * 4 + 12) * c    # weights + biases + osum
               + 2 * 1024 * c * 4)                     # per-strip live temporaries
        if est <= budget:
            return c
    return min(cands)


def _pick_row_tile(sp, cexp, planes, y_bytes, budget, cap=2048):
    """Spatial tile for K3: prefer a multiple of 128 (lane-dense output stores)."""
    t = cap
    while t >= 128:
        if sp % t == 0:
            est = (2 * t * cexp * y_bytes + 4 * t * planes * 4
                   + 2 * cexp * planes * 2 + 4 * cexp * 4)
            if est <= budget:
                return t
        t //= 2
    t = 64
    while t >= 8:
        if sp % t == 0:
            return t
        t //= 2
    return sp


# ----------------------------- Pallas kernels ---------------------------------

def _expand_dw_kernel(x_ref, we_ref, be_ref, wd_ref, bd_ref,
                      o_ref, osum_ref, xpad_ref, *,
                      k, stride, act, mm_dtype, col_start, rh, oh_t):
    """K1: expand 1x1 conv (+BN+act) -> depthwise kxk conv (+BN+act, strided).

    x_ref:    (1, H, W, Cin)     full input image (small tensor)
    we_ref:   (Cin, ct)          expand weight (BN scale folded), mm_dtype
    be_ref:   (1, ct)            expand BN bias (f32)
    wd_ref:   (k, k, ct)         depthwise weight (BN scale folded), f32
    bd_ref:   (1, ct)            depthwise BN bias (f32)
    o_ref:    (1, Ho, Wo, ct)    strided dwconv output (mm_dtype)
    osum_ref: (1, 1, ct)         per-(n, channel) spatial sum (f32, for SE pooling)
    xpad_ref: (Hp, Wpad, ct)     VMEM scratch: zero-padded expand output, interior
                                 stored at sublane-aligned column `col_start`.
    """
    h, w, cin = x_ref.shape[1], x_ref.shape[2], x_ref.shape[3]
    ho, wo, ct = o_ref.shape[1], o_ref.shape[2], o_ref.shape[3]
    hp, wpad = xpad_ref.shape[0], xpad_ref.shape[1]
    p = (k - 1) // 2

    # ---- zero only the halo border strips (interior is fully overwritten). ----
    if p > 0:
        zrow = jnp.zeros((p, wpad, ct), jnp.float32)
        xpad_ref[0:p, :, :] = zrow
        xpad_ref[p + h:hp, :, :] = zrow
    if col_start > 0:
        xpad_ref[p:p + h, 0:col_start, :] = jnp.zeros((h, col_start, ct), jnp.float32)
    if wpad > col_start + w:
        xpad_ref[p:p + h, col_start + w:wpad, :] = jnp.zeros(
            (h, wpad - col_start - w, ct), jnp.float32)

    # ---- expand 1x1 conv (MXU), one row strip at a time into the halo scratch ----
    we = we_ref[...].astype(mm_dtype)
    be = be_ref[...]

    @pl.loop(0, h // rh)
    def _expand(i):
        r0 = pl.multiple_of(i * rh, rh)
        xs = x_ref[0, pl.ds(r0, rh), :, :].reshape(rh * w, cin).astype(mm_dtype)
        y = jnp.dot(xs, we, preferred_element_type=jnp.float32)
        y = _apply_act(y + be, act)
        xpad_ref[pl.ds(p + r0, rh), pl.ds(col_start, w), :] = y.reshape(rh, w, ct)

    # ---- depthwise kxk conv (VPU, f32), one output row strip at a time ----
    wv = wd_ref[...]                                    # (k, k, ct) f32
    bd = bd_ref[...]
    osum_ref[...] = jnp.zeros_like(osum_ref)

    @pl.loop(0, ho // oh_t)
    def _dw(i):
        o0 = pl.multiple_of(i * oh_t, oh_t)
        acc = jnp.zeros((oh_t, wo, ct), jnp.float32)
        for ki in range(k):                             # static unrolled taps
            for kj in range(k):
                col0 = col_start - p + kj
                if stride == 1:
                    win = xpad_ref[pl.ds(o0 + ki, oh_t), pl.ds(col0, wo), :]
                else:
                    # TODO(synk): pre-split column parity so stride-2 taps become
                    # contiguous sublane reads instead of strided loads.
                    win = xpad_ref[pl.ds(o0 * stride + ki, oh_t, stride),
                                   pl.ds(col0, wo, stride), :]
                acc = acc + win * wv[ki:ki + 1, kj:kj + 1, :]
        yd = _apply_act(acc + bd, act)                  # (oh_t, wo, ct) f32
        o_ref[0, pl.ds(o0, oh_t), :, :] = yd.astype(o_ref.dtype)
        s = jnp.sum(yd.reshape(oh_t * wo, ct), axis=0, keepdims=True)
        osum_ref[...] = osum_ref[...] + s.reshape(1, 1, ct)


def _se_scale_kernel(sum_ref, w1_ref, b1_ref, w2_ref, b2_ref, o_ref, *, inv_hw):
    """K2: SE scale from pooled sums: mean -> 1x1 -> relu -> 1x1 -> hard-sigmoid."""
    n = sum_ref.shape[0]
    cexp = sum_ref.shape[2]
    m = sum_ref[...].reshape(n, cexp) * inv_hw                      # (N, Cexp) mean
    hdn = jnp.dot(m, w1_ref[...], preferred_element_type=jnp.float32) + b1_ref[...]
    hdn = jnp.maximum(hdn, 0.0)
    s = jnp.dot(hdn, w2_ref[...], preferred_element_type=jnp.float32) + b2_ref[...]
    s = jnp.clip(s + 3.0, 0.0, 6.0) * (1.0 / 6.0)                   # hard-sigmoid
    o_ref[...] = s.reshape(n, 1, cexp).astype(o_ref.dtype)


def _pw_kernel(*refs, use_se, use_res, mm_dtype):
    """K3: pointwise 1x1 conv + BN, fused SE rescale + residual, channel-major out."""
    idx = 0
    y_ref = refs[idx]; idx += 1
    se_ref = None
    if use_se:
        se_ref = refs[idx]; idx += 1
    w_ref = refs[idx]; b_ref = refs[idx + 1]; idx += 2
    res_ref = None
    if use_res:
        res_ref = refs[idx]; idx += 1
    o_ref = refs[idx]

    a = y_ref[0].astype(jnp.float32)                     # (tsp, Cexp)
    if use_se:
        a = a * se_ref[0]                                # (1, Cexp) broadcast
    # Lane-dense output: (planes, tsp) = wT (planes, Cexp) contracted with a (tsp, Cexp)
    acc = lax.dot_general(w_ref[...].astype(mm_dtype), a.astype(mm_dtype),
                          dimension_numbers=(((1,), (1,)), ((), ())),
                          preferred_element_type=jnp.float32)
    acc = acc + b_ref[...]                               # (planes, 1) bias
    if use_res:
        acc = acc + res_ref[0].astype(jnp.float32)       # residual already NCHW
    o_ref[0] = acc.astype(o_ref.dtype)


# ----------------------------- pallas_call wrappers ----------------------------

def expand_dwconv(x_nhwc, we, be, wd, bd, k, stride, act, ct, mm_dtype, vmem_limit):
    n, h, w, cin = x_nhwc.shape
    cexp = we.shape[1]
    p = (k - 1) // 2
    ho = (h - 1) // stride + 1
    wo = (w - 1) // stride + 1
    hp = h + 2 * p
    col_start = _round_up(p, 8)
    wpad = _round_up(col_start + w + p, 8)
    n_ct = cexp // ct
    rh = _pick_strip(h, w)          # expand-phase row strip
    oh_t = _pick_strip(ho, wo)      # depthwise-phase output row strip

    kernel = functools.partial(_expand_dw_kernel, k=k, stride=stride, act=act,
                               mm_dtype=mm_dtype, col_start=col_start,
                               rh=rh, oh_t=oh_t)
    y, ysum = pl.pallas_call(
        kernel,
        out_shape=(jax.ShapeDtypeStruct((n, ho, wo, cexp), mm_dtype),
                   jax.ShapeDtypeStruct((n, 1, cexp), jnp.float32)),
        grid=(n, n_ct),
        in_specs=[
            pl.BlockSpec((1, h, w, cin), lambda b, c: (b, 0, 0, 0)),
            pl.BlockSpec((cin, ct), lambda b, c: (0, c)),
            pl.BlockSpec((1, ct), lambda b, c: (0, c)),
            pl.BlockSpec((k, k, ct), lambda b, c: (0, 0, c)),
            pl.BlockSpec((1, ct), lambda b, c: (0, c)),
        ],
        out_specs=(
            pl.BlockSpec((1, ho, wo, ct), lambda b, c: (b, 0, 0, c)),
            pl.BlockSpec((1, 1, ct), lambda b, c: (b, 0, c)),
        ),
        scratch_shapes=[pltpu.VMEM((hp, wpad, ct), jnp.float32)],
        compiler_params=pltpu.CompilerParams(
            dimension_semantics=("parallel", "parallel"),
            vmem_limit_bytes=vmem_limit),
    )(x_nhwc, we, be, wd, bd)
    return y, ysum


def se_scale(ysum, w1, b1, w2, b2, inv_hw, vmem_limit):
    n, _, cexp = ysum.shape
    cs = w1.shape[1]
    kernel = functools.partial(_se_scale_kernel, inv_hw=inv_hw)
    return pl.pallas_call(
        kernel,
        out_shape=jax.ShapeDtypeStruct((n, 1, cexp), jnp.float32),
        grid=(1,),
        in_specs=[
            pl.BlockSpec((n, 1, cexp), lambda i: (0, 0, 0)),
            pl.BlockSpec((cexp, cs), lambda i: (0, 0)),
            pl.BlockSpec((1, cs), lambda i: (0, 0)),
            pl.BlockSpec((cs, cexp), lambda i: (0, 0)),
            pl.BlockSpec((1, cexp), lambda i: (0, 0)),
        ],
        out_specs=pl.BlockSpec((n, 1, cexp), lambda i: (0, 0, 0)),
        compiler_params=pltpu.CompilerParams(
            dimension_semantics=("arbitrary",), vmem_limit_bytes=vmem_limit),
    )(ysum, w1, b1.reshape(1, cs), w2, b2.reshape(1, cexp))


def pointwise_conv(y_nhwc, se, wT, b, res_nchw3, mm_dtype, out_dtype,
                   vmem_limit, tile_budget):
    n, ho, wo, cexp = y_nhwc.shape
    planes = wT.shape[0]
    sp = ho * wo
    tsp = _pick_row_tile(sp, cexp, planes, jnp.dtype(y_nhwc.dtype).itemsize,
                         tile_budget)
    y3 = y_nhwc.reshape(n, sp, cexp)

    use_se = se is not None
    use_res = res_nchw3 is not None

    in_specs = [pl.BlockSpec((1, tsp, cexp), lambda bb, ss: (bb, ss, 0))]
    args = [y3]
    if use_se:
        in_specs.append(pl.BlockSpec((1, 1, cexp), lambda bb, ss: (bb, 0, 0)))
        args.append(se)
    in_specs += [pl.BlockSpec((planes, cexp), lambda bb, ss: (0, 0)),
                 pl.BlockSpec((planes, 1), lambda bb, ss: (0, 0))]
    args += [wT, b]
    if use_res:
        in_specs.append(pl.BlockSpec((1, planes, tsp), lambda bb, ss: (bb, 0, ss)))
        args.append(res_nchw3)

    kernel = functools.partial(_pw_kernel, use_se=use_se, use_res=use_res,
                               mm_dtype=mm_dtype)
    out = pl.pallas_call(
        kernel,
        out_shape=jax.ShapeDtypeStruct((n, planes, sp), out_dtype),
        grid=(n, sp // tsp),
        in_specs=in_specs,
        out_specs=pl.BlockSpec((1, planes, tsp), lambda bb, ss: (bb, 0, ss)),
        compiler_params=pltpu.CompilerParams(
            dimension_semantics=("parallel", "parallel"),
            vmem_limit_bytes=vmem_limit),
    )(*args)
    return out                                             # (n, planes, sp): NCHW layout


# ----------------------------- MBConvBlock forward -----------------------------

def _maybe_pad_channels(params, cexp, use_se):
    """Pad the expanded-channel axis to a multiple of 128 so K1 can channel-tile
    with lane-dense vregs.  Zero rows in se_w1 / pw_w make padded channels inert."""
    if cexp <= 128 or cexp % 128 == 0:
        return params, cexp
    cexp_p = _round_up(cexp, 128)
    pad = cexp_p - cexp
    p = dict(params)
    p["expand_w"] = jnp.pad(params["expand_w"], ((0, 0), (0, pad)))
    p["expand_scale"] = jnp.pad(params["expand_scale"], (0, pad))
    p["expand_bias"] = jnp.pad(params["expand_bias"], (0, pad))
    p["dw_w"] = jnp.pad(params["dw_w"], ((0, 0), (0, 0), (0, pad)))
    p["dw_scale"] = jnp.pad(params["dw_scale"], (0, pad))
    p["dw_bias"] = jnp.pad(params["dw_bias"], (0, pad))
    if use_se:
        p["se_w1"] = jnp.pad(params["se_w1"], ((0, pad), (0, 0)))
        p["se_w2"] = jnp.pad(params["se_w2"], ((0, 0), (0, pad)))
        p["se_b2"] = jnp.pad(params["se_b2"], (0, pad))
    p["pw_w"] = jnp.pad(params["pw_w"], ((0, pad), (0, 0)))
    return p, cexp_p


def mbconv_forward(x_nchw, params, cfg):
    """Pallas implementation of MBConvBlock.forward.  Input/output are NCHW."""
    mm_dtype = cfg.get("mm_dtype", jnp.bfloat16)   # MXU-native operands by default
    act = cfg["act"]
    k = cfg["kernel_size"]
    s = cfg["stride"]
    use_se = cfg["use_se"]

    n, cin, h, w = x_nchw.shape
    params, cexp = _maybe_pad_channels(params, params["expand_w"].shape[1], use_se)
    planes = params["pw_w"].shape[1]

    x_nhwc = jnp.transpose(x_nchw, (0, 2, 3, 1))   # channels on the lane axis for K1

    vmem_limit = _vmem_limit_bytes()
    tile_budget = min(vmem_limit // 3, 24 * 1024 * 1024)

    # One-time BN folding: scale into weights, bias applied in-kernel.
    we = (params["expand_w"] * params["expand_scale"][None, :]).astype(mm_dtype)
    be = params["expand_bias"].reshape(1, cexp)
    wd = params["dw_w"] * params["dw_scale"][None, None, :]   # depthwise stays f32 (VPU)
    bd = params["dw_bias"].reshape(1, cexp)
    wpT = (params["pw_w"] * params["pw_scale"][None, :]).T.astype(mm_dtype)  # (planes, Cexp)
    bp = params["pw_bias"].reshape(planes, 1)

    ct = _pick_channel_tile(cexp, cin, h, w, k, s,
                            jnp.dtype(mm_dtype).itemsize, tile_budget)
    y, ysum = expand_dwconv(x_nhwc, we, be, wd, bd, k, s, act, ct, mm_dtype, vmem_limit)
    ho, wo = y.shape[1], y.shape[2]

    se = None
    if use_se:
        se = se_scale(ysum, params["se_w1"], params["se_b1"],
                      params["se_w2"], params["se_b2"],
                      1.0 / float(ho * wo), vmem_limit)

    res = None
    if s == 1 and cfg["inplanes"] == cfg["planes"]:
        res = x_nchw.reshape(n, cin, h * w)        # residual consumed in NCHW layout

    out = pointwise_conv(y, se, wpT, bp, res, mm_dtype, x_nchw.dtype,
                         vmem_limit, tile_budget)  # (n, planes, ho*wo), channel-major
    return out.reshape(n, planes, ho, wo)          # already NCHW: no output transpose


# ----------------------------- pure-JAX reference -------------------------------

def ref_forward(x_nchw, params, cfg):
    hi = lax.Precision.HIGHEST
    x = jnp.transpose(x_nchw, (0, 2, 3, 1))
    cexp = params["expand_w"].shape[1]
    k = cfg["kernel_size"]
    s = cfg["stride"]
    p = (k - 1) // 2

    y = jnp.einsum("nhwc,cd->nhwd", x, params["expand_w"], precision=hi)
    y = y * params["expand_scale"] + params["expand_bias"]
    y = _apply_act(y, cfg["act"])

    rhs = params["dw_w"].reshape(k, k, 1, cexp)
    y = lax.conv_general_dilated(
        y, rhs, window_strides=(s, s), padding=[(p, p), (p, p)],
        dimension_numbers=("NHWC", "HWIO", "NHWC"), feature_group_count=cexp,
        precision=hi)
    y = y * params["dw_scale"] + params["dw_bias"]
    y = _apply_act(y, cfg["act"])

    if cfg["use_se"]:
        m = jnp.mean(y, axis=(1, 2))                          # (N, C)
        hdn = jnp.maximum(jnp.dot(m, params["se_w1"], precision=hi)
                          + params["se_b1"], 0.0)
        sig = jnp.clip(jnp.dot(hdn, params["se_w2"], precision=hi)
                       + params["se_b2"] + 3.0, 0.0, 6.0) / 6.0
        y = y * sig[:, None, None, :]

    out = jnp.einsum("nhwc,cd->nhwd", y, params["pw_w"], precision=hi)
    out = out * params["pw_scale"] + params["pw_bias"]
    if cfg["stride"] == 1 and cfg["inplanes"] == cfg["planes"]:
        out = out + x
    return jnp.transpose(out, (0, 3, 1, 2))


# ----------------------------- parameter construction ---------------------------

def _folded_bn(key, c):
    k1, k2, k3, k4 = jax.random.split(key, 4)
    gamma = jax.random.uniform(k1, (c,), jnp.float32, 0.5, 1.5)
    beta = jax.random.normal(k2, (c,), jnp.float32) * 0.1
    mean = jax.random.normal(k3, (c,), jnp.float32) * 0.1
    var = jax.random.uniform(k4, (c,), jnp.float32, 0.5, 1.5)
    scale = gamma / jnp.sqrt(var + 1e-5)
    bias = beta - mean * scale
    return scale, bias


def make_params(key, inplanes, expand_planes, planes, kernel_size, se_ratio=0.25):
    ks = jax.random.split(key, 12)
    squeezed = max(1, int(expand_planes * se_ratio))
    params = {}
    params["expand_w"] = jax.random.normal(ks[0], (inplanes, expand_planes), jnp.float32) * 0.1
    params["expand_scale"], params["expand_bias"] = _folded_bn(ks[1], expand_planes)
    params["dw_w"] = jax.random.normal(ks[2], (kernel_size, kernel_size, expand_planes), jnp.float32) * 0.1
    params["dw_scale"], params["dw_bias"] = _folded_bn(ks[3], expand_planes)
    params["se_w1"] = jax.random.normal(ks[4], (expand_planes, squeezed), jnp.float32) * 0.1
    params["se_b1"] = jax.random.normal(ks[5], (squeezed,), jnp.float32) * 0.1
    params["se_w2"] = jax.random.normal(ks[6], (squeezed, expand_planes), jnp.float32) * 0.1
    params["se_b2"] = jax.random.normal(ks[7], (expand_planes,), jnp.float32) * 0.1
    params["pw_w"] = jax.random.normal(ks[8], (expand_planes, planes), jnp.float32) * 0.1
    params["pw_scale"], params["pw_bias"] = _folded_bn(ks[9], planes)
    return params


# ----------------------------- main ---------------------------------------------

if __name__ == "__main__":
    base_cfg = dict(inplanes=8, planes=8, kernel_size=3, stride=1,
                    act="hard_swish", use_se=True)
    batch, spatial, expand_planes = 2, 16, 16

    key = jax.random.PRNGKey(0)
    kx, kp = jax.random.split(key)
    x = jax.random.normal(kx, (batch, base_cfg["inplanes"], spatial, spatial),
                          jnp.float32)
    params = make_params(kp, base_cfg["inplanes"], expand_planes,
                         base_cfg["planes"], base_cfg["kernel_size"])

    ref = jax.block_until_ready(ref_forward(x, params, base_cfg))

    # Exact-parity mode (f32 MXU operands) vs the f32 reference.
    out_f32 = jax.block_until_ready(
        mbconv_forward(x, params, dict(base_cfg, mm_dtype=jnp.float32)))
    assert out_f32.shape == ref.shape == (batch, base_cfg["planes"], spatial, spatial)
    if not jnp.allclose(out_f32, ref, atol=1e-4, rtol=1e-4):
        raise AssertionError("Pallas MBConvBlock (f32) mismatch vs JAX reference")

    # Default fast path: bf16 MXU operands, f32 accumulation (looser tolerance).
    out_bf16 = jax.block_until_ready(mbconv_forward(x, params, base_cfg))
    assert out_bf16.shape == ref.shape
    if not jnp.allclose(out_bf16, ref, atol=6e-2, rtol=6e-2):
        raise AssertionError("Pallas MBConvBlock (bf16) mismatch vs JAX reference")

    print("KERNEL_OK")
</pallas_src>

<mosaic_0001>
module attributes {stable_mosaic.version = 11 : i64} {
  func.func @_expand_dw_kernel(%arg0: i32, %arg1: i32, %arg2: memref<1x16x16x8xf32, #tpu.memory_space<vmem>>, %arg3: memref<8x16xf32, #tpu.memory_space<vmem>>, %arg4: memref<1x16xf32, #tpu.memory_space<vmem>>, %arg5: memref<3x3x16xf32, #tpu.memory_space<vmem>>, %arg6: memref<1x16xf32, #tpu.memory_space<vmem>>, %arg7: memref<1x16x16x16xf32, #tpu.memory_space<vmem>>, %arg8: memref<1x1x16xf32, #tpu.memory_space<vmem>>, %arg9: memref<18x32x16xf32, #tpu.memory_space<vmem>>) attributes {dimension_semantics = [#tpu.dimension_semantics<parallel>, #tpu.dimension_semantics<parallel>], iteration_bounds = array<i64: 2, 1>, scalar_prefetch = 0 : i64, scratch_operands = 1 : i64, tpu.core_type = #tpu.core_type<tc>, window_params = [{transform_indices = @transform_0, window_bounds = array<i64: 1, 16, 16, 8>}, {transform_indices = @transform_1, window_bounds = array<i64: 8, 16>}, {transform_indices = @transform_2, window_bounds = array<i64: 1, 16>}, {transform_indices = @transform_3, window_bounds = array<i64: 3, 3, 16>}, {transform_indices = @transform_4, window_bounds = array<i64: 1, 16>}, {transform_indices = @transform_5, window_bounds = array<i64: 1, 16, 16, 16>}, {transform_indices = @transform_6, window_bounds = array<i64: 1, 1, 16>}]} {
    %cst = arith.constant 0.000000e+00 : f32
    %0 = vector.broadcast %cst : f32 to vector<1x32x16xf32>
    %c0 = arith.constant 0 : index
    %c0_0 = arith.constant 0 : index
    %c0_1 = arith.constant 0 : index
    %1 = vector.load %arg9[%c0, %c0_0, %c0_1] : memref<18x32x16xf32, #tpu.memory_space<vmem>>, vector<1x32x16xf32>
    tpu.vector_store %arg9[%c0, %c0_0, %c0_1], %0 {strides = array<i32>} : memref<18x32x16xf32, #tpu.memory_space<vmem>>, vector<1x32x16xf32>,
    %c17 = arith.constant 17 : index
    %c0_2 = arith.constant 0 : index
    %c0_3 = arith.constant 0 : index
    %2 = vector.load %arg9[%c17, %c0_2, %c0_3] : memref<18x32x16xf32, #tpu.memory_space<vmem>>, vector<1x32x16xf32>
    tpu.vector_store %arg9[%c17, %c0_2, %c0_3], %0 {strides = array<i32>} : memref<18x32x16xf32, #tpu.memory_space<vmem>>, vector<1x32x16xf32>,
    %cst_4 = arith.constant 0.000000e+00 : f32
    %3 = vector.broadcast %cst_4 : f32 to vector<16x8x16xf32>
    %c1 = arith.constant 1 : index
    %c0_5 = arith.constant 0 : index
    %c0_6 = arith.constant 0 : index
    %4 = vector.load %arg9[%c1, %c0_5, %c0_6] : memref<18x32x16xf32, #tpu.memory_space<vmem>>, vector<16x8x16xf32>
    tpu.vector_store %arg9[%c1, %c0_5, %c0_6], %3 {strides = array<i32>} : memref<18x32x16xf32, #tpu.memory_space<vmem>>, vector<16x8x16xf32>,
    %cst_7 = arith.constant 0.000000e+00 : f32
    %5 = vector.broadcast %cst_7 : f32 to vector<16x8x16xf32>
    %c1_8 = arith.constant 1 : index
    %c24 = arith.constant 24 : index
    %c0_9 = arith.constant 0 : index
    %6 = vector.load %arg9[%c1_8, %c24, %c0_9] : memref<18x32x16xf32, #tpu.memory_space<vmem>>, vector<16x8x16xf32>
    tpu.vector_store %arg9[%c1_8, %c24, %c0_9], %5 {strides = array<i32>} : memref<18x32x16xf32, #tpu.memory_space<vmem>>, vector<16x8x16xf32>,
    %c0_10 = arith.constant 0 : index
    %c0_11 = arith.constant 0 : index
    %7 = vector.load %arg3[%c0_10, %c0_11] : memref<8x16xf32, #tpu.memory_space<vmem>>, vector<8x16xf32>
    %c0_12 = arith.constant 0 : index
    %c0_13 = arith.constant 0 : index
    %8 = vector.load %arg4[%c0_12, %c0_13] : memref<1x16xf32, #tpu.memory_space<vmem>>, vector<1x16xf32>
    %c0_i32 = arith.constant 0 : i32
    %c1_i32 = arith.constant 1 : i32
    %9 = arith.muli %c0_i32, %c1_i32 : i32
    %c0_i32_14 = arith.constant 0 : i32
    %10 = arith.addi %c0_i32_14, %9 : i32
    %c16_i32 = arith.constant 16 : i32
    %11 = arith.muli %10, %c16_i32 : i32
    %12 = tpu.assume_multiple %11, 16 : i32
    %c0_15 = arith.constant 0 : index
    %13 = arith.index_cast %12 : i32 to index
    %c0_16 = arith.constant 0 : index
    %c0_17 = arith.constant 0 : index
    %14 = vector.load %arg2[%c0_15, %13, %c0_16, %c0_17] : memref<1x16x16x8xf32, #tpu.memory_space<vmem>>, vector<1x16x16x8xf32>
    %15 = vector.shape_cast %14 : vector<1x16x16x8xf32> to vector<16x16x8xf32>
    %16 = vector.shape_cast %15 : vector<16x16x8xf32> to vector<256x8xf32>
    %cst_18 = arith.constant dense<0.000000e+00> : vector<256x16xf32>
    %17 = tpu.matmul %16, %7, %cst_18 {dimension_numbers = #tpu.dot_dimension_numbers<[1], [0], [0], [1], [0, 0, 1, 1], [], []>} : vector<256x8xf32>, vector<8x16xf32>, vector<256x16xf32> -> vector<256x16xf32>
    %18 = vector.broadcast %8 : vector<1x16xf32> to vector<256x16xf32>
    %19 = arith.addf %17, %18 : vector<256x16xf32>
    %cst_19 = arith.constant 3.000000e+00 : f32
    %20 = vector.broadcast %cst_19 : f32 to vector<256x16xf32>
    %21 = arith.addf %19, %20 : vector<256x16xf32>
    %cst_20 = arith.constant 0.000000e+00 : f32
    %cst_21 = arith.constant 6.000000e+00 : f32
    %22 = vector.broadcast %cst_20 : f32 to vector<256x16xf32>
    %23 = arith.maximumf %22, %21 : vector<256x16xf32>
    %24 = vector.broadcast %cst_21 : f32 to vector<256x16xf32>
    %25 = arith.minimumf %24, %23 : vector<256x16xf32>
    %cst_22 = arith.constant 0.166666672 : f32
    %26 = vector.broadcast %cst_22 : f32 to vector<256x16xf32>
    %27 = arith.mulf %25, %26 : vector<256x16xf32>
    %28 = arith.mulf %19, %27 : vector<256x16xf32>
    %29 = vector.shape_cast %28 : vector<256x16xf32> to vector<16x16x16xf32>
    %c1_i32_23 = arith.constant 1 : i32
    %30 = arith.addi %c1_i32_23, %12 : i32
    %31 = arith.index_cast %30 : i32 to index
    %c8 = arith.constant 8 : index
    %c0_24 = arith.constant 0 : index
    %32 = vector.load %arg9[%31, %c8, %c0_24] : memref<18x32x16xf32, #tpu.memory_space<vmem>>, vector<16x16x16xf32>
    tpu.vector_store %arg9[%31, %c8, %c0_24], %29 {strides = array<i32>} : memref<18x32x16xf32, #tpu.memory_space<vmem>>, vector<16x16x16xf32>,
    %c1_i32_25 = arith.constant 1 : i32
    %c0_26 = arith.constant 0 : index
    %c0_27 = arith.constant 0 : index
    %c0_28 = arith.constant 0 : index
    %33 = vector.load %arg5[%c0_26, %c0_27, %c0_28] : memref<3x3x16xf32, #tpu.memory_space<vmem>>, vector<3x3x16xf32>
    %c0_29 = arith.constant 0 : index
    %c0_30 = arith.constant 0 : index
    %34 = vector.load %arg6[%c0_29, %c0_30] : memref<1x16xf32, #tpu.memory_space<vmem>>, vector<1x16xf32>
    %cst_31 = arith.constant 0.000000e+00 : f32
    %35 = vector.broadcast %cst_31 : f32 to vector<1x1x16xf32>
    %c0_32 = arith.constant 0 : index
    %c0_33 = arith.constant 0 : index
    %c0_34 = arith.constant 0 : index
    %36 = vector.load %arg8[%c0_32, %c0_33, %c0_34] : memref<1x1x16xf32, #tpu.memory_space<vmem>>, vector<1x1x16xf32>
    tpu.vector_store %arg8[%c0_32, %c0_33, %c0_34], %35 {strides = array<i32>} : memref<1x1x16xf32, #tpu.memory_space<vmem>>, vector<1x1x16xf32>,
    %c0_i32_35 = arith.constant 0 : i32
    %c1_i32_36 = arith.constant 1 : i32
    %37 = arith.muli %c0_i32_35, %c1_i32_36 : i32
    %c0_i32_37 = arith.constant 0 : i32
    %38 = arith.addi %c0_i32_37, %37 : i32
    %c16_i32_38 = arith.constant 16 : i32
    %39 = arith.muli %38, %c16_i32_38 : i32
    %40 = tpu.assume_multiple %39, 16 : i32
    %cst_39 = arith.constant 0.000000e+00 : f32
    %41 = vector.broadcast %cst_39 : f32 to vector<16x16x16xf32>
    %c0_i32_40 = arith.constant 0 : i32
    %42 = arith.addi %40, %c0_i32_40 : i32
    %43 = arith.index_cast %42 : i32 to index
    %c7 = arith.constant 7 : index
    %c0_41 = arith.constant 0 : index
    %44 = vector.load %arg9[%43, %c7, %c0_41] : memref<18x32x16xf32, #tpu.memory_space<vmem>>, vector<16x16x16xf32>
    %45 = vector.extract_strided_slice %33 {offsets = [0, 0, 0], sizes = [1, 1, 16], strides = [1, 1, 1]} : vector<3x3x16xf32> to vector<1x1x16xf32>
    %46 = vector.broadcast %45 : vector<1x1x16xf32> to vector<16x16x16xf32>
    %47 = arith.mulf %44, %46 : vector<16x16x16xf32>
    %48 = arith.addf %41, %47 : vector<16x16x16xf32>
    %c0_i32_42 = arith.constant 0 : i32
    %49 = arith.addi %40, %c0_i32_42 : i32
    %50 = arith.index_cast %49 : i32 to index
    %c8_43 = arith.constant 8 : index
    %c0_44 = arith.constant 0 : index
    %51 = vector.load %arg9[%50, %c8_43, %c0_44] : memref<18x32x16xf32, #tpu.memory_space<vmem>>, vector<16x16x16xf32>
    %52 = vector.extract_strided_slice %33 {offsets = [0, 1, 0], sizes = [1, 1, 16], strides = [1, 1, 1]} : vector<3x3x16xf32> to vector<1x1x16xf32>
    %53 = vector.broadcast %52 : vector<1x1x16xf32> to vector<16x16x16xf32>
    %54 = arith.mulf %51, %53 : vector<16x16x16xf32>
    %55 = arith.addf %48, %54 : vector<16x16x16xf32>
    %c0_i32_45 = arith.constant 0 : i32
    %56 = arith.addi %40, %c0_i32_45 : i32
    %57 = arith.index_cast %56 : i32 to index
    %c9 = arith.constant 9 : index
    %c0_46 = arith.constant 0 : index
    %58 = vector.load %arg9[%57, %c9, %c0_46] : memref<18x32x16xf32, #tpu.memory_space<vmem>>, vector<16x16x16xf32>
    %59 = vector.extract_strided_slice %33 {offsets = [0, 2, 0], sizes = [1, 1, 16], strides = [1, 1, 1]} : vector<3x3x16xf32> to vector<1x1x16xf32>
    %60 = vector.broadcast %59 : vector<1x1x16xf32> to vector<16x16x16xf32>
    %61 = arith.mulf %58, %60 : vector<16x16x16xf32>
    %62 = arith.addf %55, %61 : vector<16x16x16xf32>
    %c1_i32_47 = arith.constant 1 : i32
    %63 = arith.addi %40, %c1_i32_47 : i32
    %64 = arith.index_cast %63 : i32 to index
    %c7_48 = arith.constant 7 : index
    %c0_49 = arith.constant 0 : index
    %65 = vector.load %arg9[%64, %c7_48, %c0_49] : memref<18x32x16xf32, #tpu.memory_space<vmem>>, vector<16x16x16xf32>
    %66 = vector.extract_strided_slice %33 {offsets = [1, 0, 0], sizes = [1, 1, 16], strides = [1, 1, 1]} : vector<3x3x16xf32> to vector<1x1x16xf32>
    %67 = vector.broadcast %66 : vector<1x1x16xf32> to vector<16x16x16xf32>
    %68 = arith.mulf %65, %67 : vector<16x16x16xf32>
    %69 = arith.addf %62, %68 : vector<16x16x16xf32>
    %c1_i32_50 = arith.constant 1 : i32
    %70 = arith.addi %40, %c1_i32_50 : i32
    %71 = arith.index_cast %70 : i32 to index
    %c8_51 = arith.constant 8 : index
    %c0_52 = arith.constant 0 : index
    %72 = vector.load %arg9[%71, %c8_51, %c0_52] : memref<18x32x16xf32, #tpu.memory_space<vmem>>, vector<16x16x16xf32>
    %73 = vector.extract_strided_slice %33 {offsets = [1, 1, 0], sizes = [1, 1, 16], strides = [1, 1, 1]} : vector<3x3x16xf32> to vector<1x1x16xf32>
    %74 = vector.broadcast %73 : vector<1x1x16xf32> to vector<16x16x16xf32>
    %75 = arith.mulf %72, %74 : vector<16x16x16xf32>
    %76 = arith.addf %69, %75 : vector<16x16x16xf32>
    %c1_i32_53 = arith.constant 1 : i32
    %77 = arith.addi %40, %c1_i32_53 : i32
    %78 = arith.index_cast %77 : i32 to index
    %c9_54 = arith.constant 9 : index
    %c0_55 = arith.constant 0 : index
    %79 = vector.load %arg9[%78, %c9_54, %c0_55] : memref<18x32x16xf32, #tpu.memory_space<vmem>>, vector<16x16x16xf32>
    %80 = vector.extract_strided_slice %33 {offsets = [1, 2, 0], sizes = [1, 1, 16], strides = [1, 1, 1]} : vector<3x3x16xf32> to vector<1x1x16xf32>
    %81 = vector.broadcast %80 : vector<1x1x16xf32> to vector<16x16x16xf32>
    %82 = arith.mulf %79, %81 : vector<16x16x16xf32>
    %83 = arith.addf %76, %82 : vector<16x16x16xf32>
    %c2_i32 = arith.constant 2 : i32
    %84 = arith.addi %40, %c2_i32 : i32
    %85 = arith.index_cast %84 : i32 to index
    %c7_56 = arith.constant 7 : index
    %c0_57 = arith.constant 0 : index
    %86 = vector.load %arg9[%85, %c7_56, %c0_57] : memref<18x32x16xf32, #tpu.memory_space<vmem>>, vector<16x16x16xf32>
    %87 = vector.extract_strided_slice %33 {offsets = [2, 0, 0], sizes = [1, 1, 16], strides = [1, 1, 1]} : vector<3x3x16xf32> to vector<1x1x16xf32>
    %88 = vector.broadcast %87 : vector<1x1x16xf32> to vector<16x16x16xf32>
    %89 = arith.mulf %86, %88 : vector<16x16x16xf32>
    %90 = arith.addf %83, %89 : vector<16x16x16xf32>
    %c2_i32_58 = arith.constant 2 : i32
    %91 = arith.addi %40, %c2_i32_58 : i32
    %92 = arith.index_cast %91 : i32 to index
    %c8_59 = arith.constant 8 : index
    %c0_60 = arith.constant 0 : index
    %93 = vector.load %arg9[%92, %c8_59, %c0_60] : memref<18x32x16xf32, #tpu.memory_space<vmem>>, vector<16x16x16xf32>
    %94 = vector.extract_strided_slice %33 {offsets = [2, 1, 0], sizes = [1, 1, 16], strides = [1, 1, 1]} : vector<3x3x16xf32> to vector<1x1x16xf32>
    %95 = vector.broadcast %94 : vector<1x1x16xf32> to vector<16x16x16xf32>
    %96 = arith.mulf %93, %95 : vector<16x16x16xf32>
    %97 = arith.addf %90, %96 : vector<16x16x16xf32>
    %c2_i32_61 = arith.constant 2 : i32
    %98 = arith.addi %40, %c2_i32_61 : i32
    %99 = arith.index_cast %98 : i32 to index
    %c9_62 = arith.constant 9 : index
    %c0_63 = arith.constant 0 : index
    %100 = vector.load %arg9[%99, %c9_62, %c0_63] : memref<18x32x16xf32, #tpu.memory_space<vmem>>, vector<16x16x16xf32>
    %101 = vector.extract_strided_slice %33 {offsets = [2, 2, 0], sizes = [1, 1, 16], strides = [1, 1, 1]} : vector<3x3x16xf32> to vector<1x1x16xf32>
    %102 = vector.broadcast %101 : vector<1x1x16xf32> to vector<16x16x16xf32>
    %103 = arith.mulf %100, %102 : vector<16x16x16xf32>
    %104 = arith.addf %97, %103 : vector<16x16x16xf32>
    %105 = vector.shape_cast %34 : vector<1x16xf32> to vector<1x1x16xf32>
    %106 = vector.broadcast %105 : vector<1x1x16xf32> to vector<16x16x16xf32>
    %107 = arith.addf %104, %106 : vector<16x16x16xf32>
    %cst_64 = arith.constant 3.000000e+00 : f32
    %108 = vector.broadcast %cst_64 : f32 to vector<16x16x16xf32>
    %109 = arith.addf %107, %108 : vector<16x16x16xf32>
    %cst_65 = arith.constant 0.000000e+00 : f32
    %cst_66 = arith.constant 6.000000e+00 : f32
    %110 = vector.broadcast %cst_65 : f32 to vector<16x16x16xf32>
    %111 = arith.maximumf %110, %109 : vector<16x16x16xf32>
    %112 = vector.broadcast %cst_66 : f32 to vector<16x16x16xf32>
    %113 = arith.minimumf %112, %111 : vector<16x16x16xf32>
    %cst_67 = arith.constant 0.166666672 : f32
    %114 = vector.broadcast %cst_67 : f32 to vector<16x16x16xf32>
    %115 = arith.mulf %113, %114 : vector<16x16x16xf32>
    %116 = arith.mulf %107, %115 : vector<16x16x16xf32>
    %c0_68 = arith.constant 0 : index
    %117 = arith.index_cast %40 : i32 to index
    %c0_69 = arith.constant 0 : index
    %c0_70 = arith.constant 0 : index
    %118 = vector.load %arg7[%c0_68, %117, %c0_69, %c0_70] : memref<1x16x16x16xf32, #tpu.memory_space<vmem>>, vector<1x16x16x16xf32>
    %119 = vector.shape_cast %118 : vector<1x16x16x16xf32> to vector<16x16x16xf32>
    %120 = vector.shape_cast %116 : vector<16x16x16xf32> to vector<1x16x16x16xf32>
    tpu.vector_store %arg7[%c0_68, %117, %c0_69, %c0_70], %120 {strides = array<i32>} : memref<1x16x16x16xf32, #tpu.memory_space<vmem>>, vector<1x16x16x16xf32>,
    %121 = vector.shape_cast %116 : vector<16x16x16xf32> to vector<256x16xf32>
    %cst_71 = arith.constant dense<0.000000e+00> : vector<16xf32>
    %122 = vector.multi_reduction <add>, %121, %cst_71 [0] : vector<256x16xf32> to vector<16xf32>
    %123 = vector.shape_cast %122 : vector<16xf32> to vector<1x16xf32>
    %c0_72 = arith.constant 0 : index
    %c0_73 = arith.constant 0 : index
    %c0_74 = arith.constant 0 : index
    %124 = vector.load %arg8[%c0_72, %c0_73, %c0_74] : memref<1x1x16xf32, #tpu.memory_space<vmem>>, vector<1x1x16xf32>
    %125 = vector.shape_cast %123 : vector<1x16xf32> to vector<1x1x16xf32>
    %126 = arith.addf %124, %125 : vector<1x1x16xf32>
    %c0_75 = arith.constant 0 : index
    %c0_76 = arith.constant 0 : index
    %c0_77 = arith.constant 0 : index
    %127 = vector.load %arg8[%c0_75, %c0_76, %c0_77] : memref<1x1x16xf32, #tpu.memory_space<vmem>>, vector<1x1x16xf32>
    tpu.vector_store %arg8[%c0_75, %c0_76, %c0_77], %126 {strides = array<i32>} : memref<1x1x16xf32, #tpu.memory_space<vmem>>, vector<1x1x16xf32>,
    %c1_i32_78 = arith.constant 1 : i32
    return
  }
  func.func @transform_0(%arg0: i32, %arg1: i32) -> (i32, i32, i32, i32) {
    %c0_i32 = arith.constant 0 : i32
    %c0_i32_0 = arith.constant 0 : i32
    %c0_i32_1 = arith.constant 0 : i32
    %c0_i32_2 = arith.constant 0 : i32
    return %arg0, %c0_i32, %c0_i32_0, %c0_i32_1 : i32, i32, i32, i32
  }
  func.func @transform_1(%arg0: i32, %arg1: i32) -> (i32, i32) {
    %c0_i32 = arith.constant 0 : i32
    %c0_i32_0 = arith.constant 0 : i32
    return %c0_i32, %arg1 : i32, i32
  }
  func.func @transform_2(%arg0: i32, %arg1: i32) -> (i32, i32) {
    %c0_i32 = arith.constant 0 : i32
    %c0_i32_0 = arith.constant 0 : i32
    return %c0_i32, %arg1 : i32, i32
  }
  func.func @transform_3(%arg0: i32, %arg1: i32) -> (i32, i32, i32) {
    %c0_i32 = arith.constant 0 : i32
    %c0_i32_0 = arith.constant 0 : i32
    %c0_i32_1 = arith.constant 0 : i32
    return %c0_i32, %c0_i32_0, %arg1 : i32, i32, i32
  }
  func.func @transform_4(%arg0: i32, %arg1: i32) -> (i32, i32) {
    %c0_i32 = arith.constant 0 : i32
    %c0_i32_0 = arith.constant 0 : i32
    return %c0_i32, %arg1 : i32, i32
  }
  func.func @transform_5(%arg0: i32, %arg1: i32) -> (i32, i32, i32, i32) {
    %c0_i32 = arith.constant 0 : i32
    %c0_i32_0 = arith.constant 0 : i32
    %c0_i32_1 = arith.constant 0 : i32
    return %arg0, %c0_i32, %c0_i32_0, %arg1 : i32, i32, i32, i32
  }
  func.func @transform_6(%arg0: i32, %arg1: i32) -> (i32, i32, i32) {
    %c0_i32 = arith.constant 0 : i32
    %c0_i32_0 = arith.constant 0 : i32
    return %arg0, %c0_i32, %arg1 : i32, i32, i32
  }
}

</mosaic_0001>

<bundles_post_ra>
// kernel: tpu_custom_call.1
= control target key start
LH: loop header
LB: loop body
LE: loop exit
PB: predicated region body
PF: predicated region fallthrough
CT: control target
= control target key end

     0   :  { %12 = vsyncpa [#allocation4], 0  ;;  %s4133_s0 = inlined_call_operand.vmem [shape: f32[2,16,16,8], index: 0, kind: input, shape index: {}]   ;;  %s4134_s1 = inlined_call_operand.vmem [shape: f32[8,16], index: 1, kind: input, shape index: {}]   ;;  %s4135_s2 = inlined_call_operand.vmem [shape: f32[1,16], index: 2, kind: input, shape index: {}]   ;;  %s4136_s3 = inlined_call_operand.vmem [shape: f32[3,3,16], index: 3, kind: input, shape index: {}]   ;;  %s4137_s4 = inlined_call_operand.vmem [shape: f32[1,16], index: 4, kind: input, shape index: {}]   ;;  %s4138_s5 = inlined_call_operand.hbm [shape: f32[2,16,16,16], index: 5, kind: output, shape index: {0}]   ;;  %s4139_s6 = inlined_call_operand.hbm [shape: f32[2,1,16], index: 6, kind: output, shape index: {1}]  }
   0x1   :  { %14 = vsyncpa [#allocation4 + $0x1], 0 }
   0x2   :  { %15 = vsyncpa [#allocation6], 0 }
   0x3   :  { %17 = vsyncpa [#allocation6 + $0x1], 0  ;;  %s2700_s21 = smov 0   ;;  %s2702_s22 = smov 0  }
   0x4   :  { %s2704_s23 = smov 0   ;;  %s2706_s24 = smov 0  }
   0x5   :  { %s2708_s25 = smov 0   ;;  %s2710_s26 = smov 0  }
   0x6 LB: > { %s2344_s27 = sadd.s32 4294967295, %s2658_s26   ;;  %s2345_s28 = sadd.s32 4294967294, %s2658_s26   ;;  %s2658_s26 = sphi %s2710_s26, %s23_s26   ;;  %s2654_s25 = sphi %s2708_s25, %s4272_s25   ;;  %s2650_s24 = sphi %s2706_s24, %s4271_s24   ;;  %s2646_s23 = sphi %s2704_s23, %s4270_s23   ;;  %s2642_s22 = sphi %s2702_s22, %s4269_s22   ;;  %s2638_s21 = sphi %s2700_s21, %s4268_s21  }
   0x7   : > { %s35_s29 = sadd.s32 1, %s2654_s25  ;;  %s174_s30 = sadd.s32 1, %s2646_s23 }
   0x8   : > { %p37_p0 = scmp.ge.s32.totalorder %s35_s29, 2  ;;  %p184_p1 = scmp.ne.s32.totalorder %s2646_s23, %s2642_s22 }
   0x9   : > { %p185_p2 = scmp.eq.s32.totalorder %s2344_s27, 1  ;;  %p190_p3 = scmp.ne.s32.totalorder %s2642_s22, %s2638_s21 }
   0xa   : > { %s4274_s29 = smov (%p37_p0, %s35_s29), 0  ;;  %p191_p5 = scmp.eq.s32.totalorder %s2345_s28, 1 }
   0xb   : > { %p2740_p4 = por %p185_p2, %p184_p1  ;;  %s169_s8 = ssub.s32 %s2654_s25, %s4274_s29 }
   0xc   : > { %p2352_p6 = scmp.ge.s32.totalorder %s2658_s26, 1  ;;  %p172_p7 = scmp.eq.s32.totalorder %s169_s8, 0 }
   0xd   : > { %p2747_p8 = por %p191_p5, %p190_p3  ;;  %p271_p9 = scmp.lt.s32.totalorder %s2658_s26, 3 }
   0xe   : > { %s2753_s10 = scalar_select %p172_p7, %s2646_s23, %s174_s30  }
   0xf   : > { %p272_p10 = pnand %p2352_p6, %p271_p9 }
  0x11   : > { %275 = sbr.rel (%p272_p10) target bundleno = 547 (0x223), region = 40 }
  0x18   : > { %v381_v0 = vld [vmem:[%s4134_s1] sm:$0xff]  ;;  %p319_p11 = scmp.lt.s32.totalorder %s2650_s24, 1  ;;  %vm338_vm0 = vcmask 130048   ;;  %v4140_v1 = vmov 0.0   ;;  %vm423_vm1 = vcmask 64512   ;;  %v980_v34 = vlaneseq  ;;  %s2397_s28 = sshll.u32 %s2650_s24, 12 }
  0x19   : > { %2431 = vmatprep.subr.mxu0 %v381_v0  ;;  %2481 = vmatprep.subr.mxu1 %v381_v0  ;;  %365 = vst.msk [vmem:[#allocation2 + $0x38] sm:$0xff] %vm338_vm0, %v4140_v1  ;;  %339 = vst.msk [vmem:[#allocation2] sm:$0xff] %vm338_vm0, %v4140_v1  ;;  %v940_v38 = vld [vmem:[%s4136_s3] sm:$0x7]  ;;  %vm944_vm2 = vcmask 122880   ;;  %s4043_s12 = scalar_lea.hbm %s4138_s5, %s2397_s28 }
  0x1a   : > { %340 = vst.msk [vmem:[#allocation2 + $0x8] sm:$0xff] %vm338_vm0, %v4140_v1  ;;  %341 = vst.msk [vmem:[#allocation2 + $0x10] sm:$0xff] %vm338_vm0, %v4140_v1  ;;  %2432 = vmatpush3.msra.mxu0 %v381_v0  ;;  %s320_s13 = scalar_select %p319_p11, %s2650_s24, 1  ;;  %2482 = vmatpush3.msra.mxu1 %v381_v0  ;;  %v981_v35 = vshrl.u32 %v980_v34, 7  ;;  %v2921_v39 = vld [vmem:[%s4135_s2] ss:$0 sm:$0xff] }
  0x1b   : > { %342 = vst.msk [vmem:[#allocation2 + $0x18] sm:$0xff] %vm338_vm0, %v4140_v1  ;;  %344 = vst.msk [vmem:[#allocation2 + $0x220] sm:$0xff] %vm338_vm0, %v4140_v1 }
  0x1c   : > { %345 = vst.msk [vmem:[#allocation2 + $0x228] sm:$0xff] %vm338_vm0, %v4140_v1  ;;  %346 = vst.msk [vmem:[#allocation2 + $0x230] sm:$0xff] %vm338_vm0, %v4140_v1  ;;  %s2396_s14 = sshll.u32 %s320_s13, 8  ;;  %v2911_v36 = vsub.s32 1, %v981_v35  ;;  %v2913_v37 = vsub.s32 0, %v981_v35  ;;  %v2930_v44 = vsub.s32 2, %v981_v35 }
  0x1d   : > { %347 = vst.msk [vmem:[#allocation2 + $0x238] sm:$0xff] %vm338_vm0, %v4140_v1  ;;  %349 = vst.msk [vmem:[#allocation2 + $0x20] sm:$0xff] %vm338_vm0, %v4140_v1  ;;  %s2845_s17 = scalar_lea.vmem %s4133_s0, %s2396_s14  ;;  %s3101_s14 = sand.u32 1, %s2642_s22  }
  0x1e   : > { %350 = vst.msk [vmem:[#allocation2 + $0x40] sm:$0xff] %vm338_vm0, %v4140_v1  ;;  %351 = vst.msk [vmem:[#allocation2 + $0x60] sm:$0xff] %vm338_vm0, %v4140_v1  ;;  %v385_v2 = vld [vmem:[%s2845_s17] sm:$0xff]  ;;  %v386_v3 = vld [vmem:[%s2845_s17 + $0x8] sm:$0xff]  ;;  %v2924_v41 = vrot.slane %v940_v38, %v2911_v36  ;;  %v2927_v42 = vrot.slane %v940_v38, %v2913_v37  ;;  %v2938_v61 = vrot.slane %v940_v38, %v2930_v44  ;;  %s2353_s15 = sshll.u32 %s3101_s14, 8  ;;  %s3938_s27 = scalar_lea.vmem [#allocation5], %s3101_s14 }
  0x1f   : > { %352 = vst.msk [vmem:[#allocation2 + $0x80] sm:$0xff] %vm338_vm0, %v4140_v1  ;;  %353 = vst.msk [vmem:[#allocation2 + $0xa0] sm:$0xff] %vm338_vm0, %v4140_v1  ;;  %v387_v4 = vld [vmem:[%s2845_s17 + $0x10] sm:$0xff]  ;;  %2433 = vmatprep.mubr.msk.f32.mxu0 %vm423_vm1, %v385_v2  ;;  %v401_v5 = vld [vmem:[%s2845_s17 + $0x80] sm:$0xff]  ;;  %s3125_s16 = scalar_lea.vmem [#allocation3], %s2353_s15  ;;  %s2155_s13 = scalar_lea.sflag [#allocation4], %s3101_s14 }
  0x20   : > { %354 = vst.msk [vmem:[#allocation2 + $0xc0] sm:$0xff] %vm338_vm0, %v4140_v1  ;;  %355 = vst.msk [vmem:[#allocation2 + $0xe0] sm:$0xff] %vm338_vm0, %v4140_v1  ;;  %2434 = vmatmul.mubr.msk.f32.vlgmr.msra.gmra.mrb[0].mxu0 %vm423_vm1, %v386_v3  ;;  %v402_v6 = vld [vmem:[%s2845_s17 + $0x88] sm:$0xff]  ;;  %v388_v7 = vld [vmem:[%s2845_s17 + $0x18] sm:$0xff]  ;;  %2457 = vmatprep.mubr.msk.f32.mxu1 %vm423_vm1, %v401_v5  ;;  %s2173_s30 = sshll.u32 %s3125_s16, 4  ;;  %s4045_s30 = int_to_ptr.vmem [resolvable:$true] %s2173_s30 }
  0x21   : > { %356 = vst.msk [vmem:[#allocation2 + $0x100] sm:$0xff] %vm338_vm0, %v4140_v1  ;;  %357 = vst.msk [vmem:[#allocation2 + $0x120] sm:$0xff] %vm338_vm0, %v4140_v1  ;;  %2436 = vmatprep.mubr.msk.f32.mxu0 %vm423_vm1, %v387_v4  ;;  %v403_v8 = vld [vmem:[%s2845_s17 + $0x90] sm:$0xff]  ;;  %v389_v9 = vld [vmem:[%s2845_s17 + $0x20] sm:$0xff]  ;;  %2458 = vmatmul.mubr.msk.f32.vlgmr.msra.gmra.mrb[0].mxu1 %vm423_vm1, %v402_v6  ;;  %s2548_s15 = scalar_lea.vmem %s4045_s30, 4096 }
  0x22   : > { %358 = vst.msk [vmem:[#allocation2 + $0x140] sm:$0xff] %vm338_vm0, %v4140_v1  ;;  %359 = vst.msk [vmem:[#allocation2 + $0x160] sm:$0xff] %vm338_vm0, %v4140_v1  ;;  %2460 = vmatprep.mubr.msk.f32.mxu1 %vm423_vm1, %v403_v8  ;;  %v404_v10 = vld [vmem:[%s2845_s17 + $0x98] sm:$0xff]  ;;  %v405_v11 = vld [vmem:[%s2845_s17 + $0xa0] sm:$0xff]  ;;  %p2549_p12 = scmp.ne.s32.totalorder %s4045_s30, %s2548_s15 }
  0x23   : > { %360 = vst.msk [vmem:[#allocation2 + $0x180] sm:$0xff] %vm338_vm0, %v4140_v1  ;;  %361 = vst.msk [vmem:[#allocation2 + $0x1a0] sm:$0xff] %vm338_vm0, %v4140_v1  ;;  %v390_v12 = vld [vmem:[%s2845_s17 + $0x28] sm:$0xff]  ;;  %v391_v13 = vld [vmem:[%s2845_s17 + $0x30] sm:$0xff] }
  0x24   : > { %362 = vst.msk [vmem:[#allocation2 + $0x1c0] sm:$0xff] %vm338_vm0, %v4140_v1  ;;  %363 = vst.msk [vmem:[#allocation2 + $0x1e0] sm:$0xff] %vm338_vm0, %v4140_v1  ;;  %2437 = vmatmul.mubr.msk.f32.gmra.mrb[2].mxu0 %vm423_vm1, %v388_v7  ;;  %v406_v14 = vld [vmem:[%s2845_s17 + $0xa8] sm:$0xff]  ;;  %v407_v15 = vld [vmem:[%s2845_s17 + $0xb0] sm:$0xff]  ;;  %p2550_p13 = pnand %p2549_p12, %p2740_p4 }
  0x25   : > { %364 = vst.msk [vmem:[#allocation2 + $0x200] sm:$0xff] %vm338_vm0, %v4140_v1  ;;  %366 = vst.msk [vmem:[#allocation2 + $0x58] sm:$0xff] %vm338_vm0, %v4140_v1  ;;  %2439 = vmatprep.mubr.msk.f32.mxu0 %vm423_vm1, %v389_v9  ;;  %2461 = vmatmul.mubr.msk.f32.gmra.mrb[2].mxu1 %vm423_vm1, %v404_v10  ;;  %v392_v16 = vld [vmem:[%s2845_s17 + $0x38] sm:$0xff]  ;;  %v393_v17 = vld [vmem:[%s2845_s17 + $0x40] sm:$0xff] }
  0x26   : > { %367 = vst.msk [vmem:[#allocation2 + $0x78] sm:$0xff] %vm338_vm0, %v4140_v1  ;;  %368 = vst.msk [vmem:[#allocation2 + $0x98] sm:$0xff] %vm338_vm0, %v4140_v1  ;;  %2463 = vmatprep.mubr.msk.f32.mxu1 %vm423_vm1, %v405_v11  ;;  %v408_v18 = vld [vmem:[%s2845_s17 + $0xb8] sm:$0xff]  ;;  %v409_v19 = vld [vmem:[%s2845_s17 + $0xc0] sm:$0xff]  ;;  %p2551_p0 = pneg %p2550_p13 }
  0x27   : > { %369 = vst.msk [vmem:[#allocation2 + $0xb8] sm:$0xff] %vm338_vm0, %v4140_v1  ;;  %370 = vst.msk [vmem:[#allocation2 + $0xd8] sm:$0xff] %vm338_vm0, %v4140_v1  ;;  %v394_v20 = vld [vmem:[%s2845_s17 + $0x48] sm:$0xff]  ;;  %v395_v21 = vld [vmem:[%s2845_s17 + $0x50] sm:$0xff] }
  0x28   : > { %371 = vst.msk [vmem:[#allocation2 + $0xf8] sm:$0xff] %vm338_vm0, %v4140_v1  ;;  %372 = vst.msk [vmem:[#allocation2 + $0x118] sm:$0xff] %vm338_vm0, %v4140_v1  ;;  %2440 = vmatmul.mubr.msk.f32.gmra.mrb[4].mxu0 %vm423_vm1, %v390_v12  ;;  %v410_v22 = vld [vmem:[%s2845_s17 + $0xc8] sm:$0xff]  ;;  %v411_v23 = vld [vmem:[%s2845_s17 + $0xd0] sm:$0xff] }
  0x29   : > { %373 = vst.msk [vmem:[#allocation2 + $0x138] sm:$0xff] %vm338_vm0, %v4140_v1  ;;  %374 = vst.msk [vmem:[#allocation2 + $0x158] sm:$0xff] %vm338_vm0, %v4140_v1  ;;  %2442 = vmatprep.mubr.msk.f32.mxu0 %vm423_vm1, %v391_v13  ;;  %2464 = vmatmul.mubr.msk.f32.gmra.mrb[4].mxu1 %vm423_vm1, %v406_v14  ;;  %v396_v24 = vld [vmem:[%s2845_s17 + $0x58] sm:$0xff]  ;;  %v397_v25 = vld [vmem:[%s2845_s17 + $0x60] sm:$0xff] }
  0x2a   : > { %375 = vst.msk [vmem:[#allocation2 + $0x178] sm:$0xff] %vm338_vm0, %v4140_v1  ;;  %376 = vst.msk [vmem:[#allocation2 + $0x198] sm:$0xff] %vm338_vm0, %v4140_v1  ;;  %2466 = vmatprep.mubr.msk.f32.mxu1 %vm423_vm1, %v407_v15  ;;  %v412_v26 = vld [vmem:[%s2845_s17 + $0xd8] sm:$0xff]  ;;  %v413_v27 = vld [vmem:[%s2845_s17 + $0xe0] sm:$0xff] }
  0x2b   : > { %377 = vst.msk [vmem:[#allocation2 + $0x1b8] sm:$0xff] %vm338_vm0, %v4140_v1  ;;  %378 = vst.msk [vmem:[#allocation2 + $0x1d8] sm:$0xff] %vm338_vm0, %v4140_v1  ;;  %v398_v28 = vld [vmem:[%s2845_s17 + $0x68] sm:$0xff]  ;;  %v399_v29 = vld [vmem:[%s2845_s17 + $0x70] sm:$0xff] }
  0x2c   : > { %379 = vst.msk [vmem:[#allocation2 + $0x1f8] sm:$0xff] %vm338_vm0, %v4140_v1  ;;  %380 = vst.msk [vmem:[#allocation2 + $0x218] sm:$0xff] %vm338_vm0, %v4140_v1  ;;  %2443 = vmatmul.mubr.msk.f32.gmra.mrb[6].mxu0 %vm423_vm1, %v392_v16  ;;  %v414_v30 = vld [vmem:[%s2845_s17 + $0xe8] sm:$0xff]  ;;  %v415_v31 = vld [vmem:[%s2845_s17 + $0xf0] sm:$0xff] }
  0x2d   : > { %2445 = vmatprep.mubr.msk.f32.mxu0 %vm423_vm1, %v393_v17  ;;  %2467 = vmatmul.mubr.msk.f32.gmra.mrb[6].mxu1 %vm423_vm1, %v408_v18  ;;  %v400_v32 = vld [vmem:[%s2845_s17 + $0x78] sm:$0xff]  ;;  %4163 = vst [vmem:[#allocation9_spill] sm:$0xff] %v2924_v41  ;;  %4164 = vst [vmem:[#allocation10_spill] sm:$0xff] %v2927_v42  ;;  %v948_v46 = vld [vmem:[#allocation2 + $0x7] sm:$0xff] }
  0x2e   : > { %2469 = vmatprep.mubr.msk.f32.mxu1 %vm423_vm1, %v409_v19  ;;  %v416_v33 = vld [vmem:[%s2845_s17 + $0xf8] sm:$0xff]  ;;  %v1048_v47 = vld [vmem:[#allocation2 + $0x8] sm:$0xff]  ;;  %v984_v55 = vmul.f32 %v2927_v42, %v948_v46  ;;  %v1049_v56 = vld [vmem:[#allocation2 + $0x10] sm:$0xff]  ;;  %4165 = vst [vmem:[#allocation11_spill] sm:$0xff] %v2938_v61  ;;  %s2661_s17 = smov [#allocation3]  }
  0x2f   : > { %v949_v51 = vld [vmem:[#allocation2 + $0xf] sm:$0xff]  ;;  %v1084_v57 = vmul.f32 %v2924_v41, %v1048_v47  ;;  %v1085_v8 = vmul.f32 %v2924_v41, %v1049_v56  ;;  %v941_v56 = vld [vmem:[%s4136_s3 + $0x4] sm:$0x7]  ;;  %s2552_s18 = sshll.u32 %s2661_s17, 4  ;;  %s2553_s18 = int_to_ptr.vmem [resolvable:$false] %s2552_s18 }
  0x30   : > { %2446 = vmatmul.mubr.msk.f32.gmra.mrb[8].mxu0 %vm423_vm1, %v394_v20  ;;  %v985_v3 = vmul.f32 %v2927_v42, %v949_v51  ;;  %s2554_s19 = scalar_lea.vmem %s2553_s18, 8192  ;;  %p2555_p1 = scmp.lt.s32.totalorder %s4045_s30, %s2553_s18 }
  0x31   : > { %2448 = vmatprep.mubr.msk.f32.mxu0 %vm423_vm1, %v395_v21  ;;  %2470 = vmatmul.mubr.msk.f32.gmra.mrb[8].mxu1 %vm423_vm1, %v410_v22  ;;  %v2944_v13 = vadd.f32 %v1084_v57, %v984_v55  ;;  %p2556_p2 = scmp.lt.s32.totalorder %s2554_s19, %s2548_s15 }
  0x32   : > { %2472 = vmatprep.mubr.msk.f32.mxu1 %vm423_vm1, %v411_v23 }
  0x33   : > { %p2557_p3 = por %p2556_p2, %p2555_p1 }
  0x34   : > { %2449 = vmatmul.mubr.msk.f32.gmra.mrb[10].mxu0 %vm423_vm1, %v396_v24 }
  0x35   : > { %2451 = vmatprep.mubr.msk.f32.mxu0 %vm423_vm1, %v397_v25  ;;  %2473 = vmatmul.mubr.msk.f32.gmra.mrb[10].mxu1 %vm423_vm1, %v412_v26  ;;  %p2558_p5 = pnand %p2557_p3, %p2551_p0 }
  0x36   : > { %2475 = vmatprep.mubr.msk.f32.mxu1 %vm423_vm1, %v413_v27 }
  0x38   : > { %2452 = vmatmul.mubr.msk.f32.gmra.mrb[12].mxu0 %vm423_vm1, %v398_v28  ;;  %v1148_v28 = vld [vmem:[#allocation2 + $0x9] sm:$0xff] }
  0x39   : > { %2454 = vmatprep.mubr.msk.f32.mxu0 %vm423_vm1, %v399_v29  ;;  %2476 = vmatmul.mubr.msk.f32.gmra.mrb[12].mxu1 %vm423_vm1, %v414_v30  ;;  %v1184_v51 = vmul.f32 %v2938_v61, %v1148_v28 }
  0x3a   : > { %2478 = vmatprep.mubr.msk.f32.mxu1 %vm423_vm1, %v415_v31 }
  0x3c   : > { %2455 = vmatmul.mubr.msk.f32.gmra.mrb[14].mxu0 %vm423_vm1, %v400_v32 }
  0x3d   : > { %2479 = vmatmul.mubr.msk.f32.gmra.mrb[14].mxu1 %vm423_vm1, %v416_v33 }
  0xf3   : > { %v2435_v40 = vpop.f32.mrb[0].mxu0 }
  0xf4   : > { %v592_v43 = vadd.f32 %v2435_v40, %v2921_v39  ;;  %v586_v45 = vpop.f32.mrb[1].mxu0  ;;  %v2459_v49 = vpop.f32.mrb[0].mxu1 }
  0xf5   : > { %v587_v48 = vadd.f32 %v2921_v39, %v586_v45  ;;  %v672_v52 = vadd.f32 %v2459_v49, %v2921_v39  ;;  %v666_v53 = vpop.f32.mrb[1].mxu1  ;;  %v1149_v45 = vld [vmem:[#allocation2 + $0x11] sm:$0xff] }
  0xf6   : > { %v746_v50 = vadd.f32 3.0, %v592_v43  ;;  %v667_v59 = vadd.f32 %v2921_v39, %v666_v53 }
  0xf7   : > { %v745_v54 = vadd.f32 3.0, %v587_v48  ;;  %v2438_v58 = vpop.f32.mrb[2].mxu0  ;;  %v762_v0 = vadd.f32 3.0, %v672_v52 }
  0xf8   : > { %v778_v60 = vmax.f32 %v746_v50, 0.0  ;;  %v602_v62 = vadd.f32 %v2438_v58, %v2921_v39  ;;  %v596_v63 = vpop.f32.mrb[3].mxu0  ;;  %v761_v5 = vadd.f32 3.0, %v667_v59  ;;  %v2462_v6 = vpop.f32.mrb[2].mxu1 }
  0xf9   : > { %v777_v2 = vmax.f32 %v745_v54, 0.0  ;;  %v597_v4 = vadd.f32 %v2921_v39, %v596_v63  ;;  %v794_v10 = vmax.f32 %v762_v0, 0.0  ;;  %v676_v11 = vpop.f32.mrb[3].mxu1  ;;  %v1117_v0 = vadd.f32 %v1085_v8, %v985_v3 }
  0xfa   : > { %v810_v7 = vmin.f32 %v778_v60, 6.0  ;;  %v748_v9 = vadd.f32 3.0, %v602_v62  ;;  %v793_v16 = vmax.f32 %v761_v5, 0.0  ;;  %v2968_v60 = vadd.f32 %v2462_v6, %v2921_v39 }
  0xfb   : > { %v809_v12 = vmin.f32 %v777_v2, 6.0  ;;  %v747_v14 = vadd.f32 3.0, %v597_v4  ;;  %v2441_v15 = vpop.f32.mrb[4].mxu0  ;;  %v826_v21 = vmin.f32 %v794_v10, 6.0  ;;  %v2980_v10 = vadd.f32 %v2921_v39, %v676_v11 }
  0xfc   : > { %v842_v17 = vmul.f32 0.16666667, %v810_v7  ;;  %v780_v18 = vmax.f32 %v748_v9, 0.0  ;;  %v612_v19 = vadd.f32 %v2441_v15, %v2921_v39  ;;  %v606_v20 = vpop.f32.mrb[5].mxu0  ;;  %v825_v25 = vmin.f32 %v793_v16, 6.0  ;;  %v2948_v26 = vpop.f32.mrb[4].mxu1 }
  0xfd   : > { %v841_v22 = vmul.f32 0.16666667, %v809_v12  ;;  %v779_v23 = vmax.f32 %v747_v14, 0.0  ;;  %v607_v24 = vadd.f32 %v2921_v39, %v606_v20  ;;  %v858_v31 = vmul.f32 0.16666667, %v826_v21  ;;  %v2950_v32 = vpop.f32.mrb[5].mxu1 }
  0xfe   : > { %v874_v27 = vmul.f32 %v842_v17, %v592_v43  ;;  %v812_v29 = vmin.f32 %v780_v18, 6.0  ;;  %v750_v30 = vadd.f32 3.0, %v612_v19  ;;  %v857_v38 = vmul.f32 0.16666667, %v825_v25 }
  0xff   : > { %v873_v33 = vmul.f32 %v841_v22, %v587_v48  ;;  %v811_v34 = vmin.f32 %v779_v23, 6.0  ;;  %v749_v35 = vadd.f32 3.0, %v607_v24  ;;  %v2444_v40 = vpop.f32.mrb[6].mxu0  ;;  %v890_v49 = vmul.f32 %v858_v31, %v672_v52 }
 0x100   : > { %909 = vst.msk [vmem:[#allocation2 + $0x30] sm:$0xff] %vm338_vm0, %v874_v27  ;;  %v844_v46 = vmul.f32 0.16666667, %v812_v29  ;;  %v782_v47 = vmax.f32 %v750_v30, 0.0  ;;  %v2954_v50 = vadd.f32 %v2444_v40, %v2921_v39  ;;  %v616_v43 = vpop.f32.mrb[7].mxu0  ;;  %v889_v54 = vmul.f32 %v857_v38, %v667_v59  ;;  %v2958_v55 = vpop.f32.mrb[6].mxu1 }
 0x101   : > { %908 = vst.msk [vmem:[#allocation2 + $0x28] sm:$0xff] %vm338_vm0, %v873_v33  ;;  %v843_v53 = vmul.f32 0.16666667, %v811_v34  ;;  %v781_v48 = vmax.f32 %v749_v35, 0.0  ;;  %4166 = vst [vmem:[#allocation12_spill] sm:$0xff] %v2958_v55  ;;  %v2965_v52 = vadd.f32 %v2921_v39, %v616_v43  ;;  %v2970_v63 = vpop.f32.mrb[7].mxu1  ;;  %v1185_v59 = vmul.f32 %v2938_v61, %v1149_v45 }
 0x102   : > { %v876_v57 = vmul.f32 %v844_v46, %v602_v62  ;;  %v814_v58 = vmin.f32 %v782_v47, 6.0  ;;  %925 = vst.msk [vmem:[#allocation2 + $0x130] sm:$0xff] %vm338_vm0, %v890_v49  ;;  %4167 = vst [vmem:[#allocation13_spill] sm:$0xff] %v2970_v63  ;;  %v942_v62 = vld [vmem:[%s4136_s3 + $0x8] sm:$0x7]  ;;  %v752_v6 = vadd.f32 3.0, %v2954_v50  ;;  %v2983_v8 = vrot.slane %v941_v56, %v2911_v36 }
 0x103   : > { %v875_v2 = vmul.f32 %v843_v53, %v597_v4  ;;  %v813_v5 = vmin.f32 %v781_v48, 6.0  ;;  %924 = vst.msk [vmem:[#allocation2 + $0x128] sm:$0xff] %vm338_vm0, %v889_v54  ;;  %v2447_v7 = vpop.f32.mrb[8].mxu0  ;;  %v2986_v4 = vrot.slane %v941_v56, %v2930_v44  ;;  %v2989_v12 = vrot.slane %v941_v56, %v2913_v37 }
 0x104   : > { %911 = vst.msk [vmem:[#allocation2 + $0x50] sm:$0xff] %vm338_vm0, %v876_v57  ;;  %v846_v9 = vmul.f32 0.16666667, %v814_v58  ;;  %v626_v3 = vpop.f32.mrb[9].mxu0  ;;  %v2992_v15 = vpop.f32.mrb[8].mxu1  ;;  %v1216_v16 = vadd.f32 %v1184_v51, %v2944_v13  ;;  %v2996_v11 = vadd.f32 3.0, %v2965_v52  ;;  %v1217_v22 = vadd.f32 %v1185_v59, %v1117_v0 }
 0x105   : > { %4168 = vst [vmem:[#allocation14_spill] sm:$0xff] %v2989_v12  ;;  %910 = vst.msk [vmem:[#allocation2 + $0x48] sm:$0xff] %vm338_vm0, %v875_v2  ;;  %v845_v14 = vmul.f32 0.16666667, %v813_v5  ;;  %v764_v18 = vadd.f32 3.0, %v2968_v60  ;;  %v2999_v20 = vpop.f32.mrb[9].mxu1  ;;  %v3002_v23 = vrot.slane %v942_v62, %v2911_v36  ;;  %v3005_v25 = vrot.slane %v942_v62, %v2930_v44 }
 0x106   : > { %4169 = vst [vmem:[#allocation15_spill] sm:$0xff] %v2992_v15  ;;  %v878_v17 = vmul.f32 %v846_v9, %v612_v19  ;;  %4170 = vst [vmem:[#allocation16_spill] sm:$0xff] %v2999_v20  ;;  %v3011_v31 = vrot.slane %v942_v62, %v2913_v37  ;;  %v784_v33 = vmax.f32 %v752_v6, 0.0  ;;  %v763_v36 = vadd.f32 3.0, %v2980_v10 }
 0x107   : > { %v1051_v21 = vld [vmem:[#allocation2 + $0x30] sm:$0xff]  ;;  %4171 = vst [vmem:[#allocation17_spill] sm:$0xff] %v3005_v25  ;;  %v877_v27 = vmul.f32 %v845_v14, %v607_v24  ;;  %v3007_v28 = vpop.f32.mrb[10].mxu0  ;;  %v783_v46 = vmax.f32 %v2996_v11, 0.0  ;;  %v796_v47 = vmax.f32 %v764_v18, 0.0  ;;  %v3025_v49 = vadd.f32 %v2447_v7, %v2921_v39 }
 0x108   : > { %v1087_v13 = vmul.f32 %v2924_v41, %v1051_v21  ;;  %v950_v19 = vld [vmem:[#allocation2 + $0x27] sm:$0xff]  ;;  %v951_v29 = vld [vmem:[#allocation2 + $0x2f] sm:$0xff]  ;;  %4172 = vst [vmem:[#allocation18_spill] sm:$0xff] %v3011_v31  ;;  %913 = vst.msk [vmem:[#allocation2 + $0x70] sm:$0xff] %vm338_vm0, %v878_v17  ;;  %v3015_v34 = vpop.f32.mrb[11].mxu0  ;;  %v1385_v56 = vmul.f32 %v2983_v8, %v1051_v21  ;;  %v795_v0 = vmax.f32 %v763_v36, 0.0  ;;  %v3037_v14 = vadd.f32 %v2921_v39, %v626_v3 }
 0x109   : > { %v1050_v30 = vld [vmem:[#allocation2 + $0x28] sm:$0xff]  ;;  %v986_v44 = vmul.f32 %v2927_v42, %v950_v19  ;;  %v987_v24 = vmul.f32 %v2927_v42, %v951_v29  ;;  %v1284_v40 = vmul.f32 %v2989_v12, %v950_v19  ;;  %912 = vst.msk [vmem:[#allocation2 + $0x68] sm:$0xff] %vm338_vm0, %v877_v27  ;;  %v1151_v37 = vld [vmem:[#allocation2 + $0x31] sm:$0xff]  ;;  %v1285_v45 = vmul.f32 %v2989_v12, %v951_v29 }
 0x10a   : > { %v1086_v35 = vmul.f32 %v2924_v41, %v1050_v30  ;;  %v1150_v38 = vld [vmem:[#allocation2 + $0x29] sm:$0xff]  ;;  %v1384_v48 = vmul.f32 %v2983_v8, %v1050_v30  ;;  %v1187_v2 = vmul.f32 %v2938_v61, %v1151_v37  ;;  %v3039_v11 = vmin.f32 %v784_v33, 6.0 }
 0x10b   : > { %v1119_v51 = vadd.f32 %v1087_v13, %v987_v24  ;;  %v1316_v53 = vadd.f32 %v1284_v40, %v1216_v16  ;;  %v3028_v54 = vpop.f32.mrb[12].mxu0  ;;  %v1186_v57 = vmul.f32 %v2938_v61, %v1150_v38  ;;  %v1317_v58 = vadd.f32 %v1285_v45, %v1217_v22  ;;  %v1053_v27 = vld [vmem:[#allocation2 + $0x50] sm:$0xff] }
 0x10c   : > { %v1118_v43 = vadd.f32 %v1086_v35, %v986_v44  ;;  %4173 = vst [vmem:[#allocation19_spill] sm:$0xff] %v3028_v54  ;;  %v3032_v59 = vpop.f32.mrb[13].mxu0  ;;  %v1484_v7 = vmul.f32 %v2986_v4, %v1150_v38  ;;  %v952_v62 = vld [vmem:[#allocation2 + $0x47] sm:$0xff]  ;;  %v953_v9 = vld [vmem:[#allocation2 + $0x4f] sm:$0xff]  ;;  %v3041_v18 = vmin.f32 %v796_v47, 6.0  ;;  %v1485_v21 = vmul.f32 %v2986_v4, %v1151_v37 }
 0x10d   : > { %4174 = vst [vmem:[#allocation20_spill] sm:$0xff] %v3032_v59  ;;  %v1416_v5 = vadd.f32 %v1384_v48, %v1316_v53  ;;  %v1052_v6 = vld [vmem:[#allocation2 + $0x48] sm:$0xff]  ;;  %v1417_v17 = vadd.f32 %v1385_v56, %v1317_v58  ;;  %v1219_v13 = vadd.f32 %v1187_v2, %v1119_v51  ;;  %v3045_v19 = vadd.f32 3.0, %v3025_v49  ;;  %v1153_v53 = vld [vmem:[#allocation2 + $0x51] sm:$0xff] }
 0x10e   : > { %v1218_v16 = vadd.f32 %v1186_v57, %v1118_v43  ;;  %v988_v30 = vmul.f32 %v2927_v42, %v952_v62  ;;  %v1088_v3 = vmul.f32 %v2924_v41, %v1052_v6  ;;  %v1286_v36 = vmul.f32 %v2989_v12, %v952_v62  ;;  %v1152_v45 = vld [vmem:[#allocation2 + $0x49] sm:$0xff] }
 0x10f   : > { %v1516_v22 = vadd.f32 %v1484_v7, %v1416_v5  ;;  %v3047_v29 = vpop.f32.mrb[14].mxu0  ;;  %v1287_v33 = vmul.f32 %v2989_v12, %v953_v9  ;;  %v1517_v24 = vadd.f32 %v1485_v21, %v1417_v17  ;;  %v1587_v35 = vmul.f32 %v3011_v31, %v952_v62 }
 0x110   : > { %4175 = vst [vmem:[#allocation21_spill] sm:$0xff] %v3047_v29  ;;  %v3053_v44 = vpop.f32.mrb[15].mxu0  ;;  %v3056_v38 = vmin.f32 %v783_v46, 6.0  ;;  %v3058_v40 = vmin.f32 %v795_v0, 6.0  ;;  %v1089_v37 = vmul.f32 %v2924_v41, %v1053_v27  ;;  %v1318_v47 = vadd.f32 %v1286_v36, %v1218_v16  ;;  %v3067_v46 = vld [vmem:[#allocation2 + $0x130] sm:$0xff] }
 0x111   : > { %4176 = vst [vmem:[#allocation22_spill] sm:$0xff] %v3053_v44  ;;  %v1588_v43 = vmul.f32 %v3011_v31, %v953_v9  ;;  %v3063_v51 = vadd.f32 3.0, %v3037_v14  ;;  %v1319_v48 = vadd.f32 %v1287_v33, %v1219_v13  ;;  %v1386_v56 = vmul.f32 %v2983_v8, %v1052_v6  ;;  %v3073_v13 = vpop.f32.mrb[10].mxu1  ;;  %v955_v29 = vld [vmem:[#allocation2 + $0x6f] sm:$0xff] }
 0x112   : > { %v1619_v57 = vadd.f32 %v1587_v35, %v1516_v22  ;;  %v1687_v58 = vmul.f32 %v3002_v23, %v1052_v6  ;;  %v1688_v0 = vmul.f32 %v3002_v23, %v1053_v27  ;;  %v989_v2 = vmul.f32 %v2927_v42, %v953_v9  ;;  %4177 = vst [vmem:[#allocation23_spill] sm:$0xff] %v3073_v13  ;;  %v3079_v6 = vld [vmem:[%s4137_s4] ss:$0 sm:$0xff] }
 0x113   : > { %v1120_v5 = vadd.f32 %v1088_v3, %v988_v30  ;;  %v1620_v7 = vadd.f32 %v1588_v43, %v1517_v24  ;;  %v1387_v62 = vmul.f32 %v2983_v8, %v1053_v27  ;;  %v1418_v16 = vadd.f32 %v1386_v56, %v1318_v47  ;;  %v1055_v30 = vld [vmem:[#allocation2 + $0x70] sm:$0xff]  ;;  %v954_v3 = vld [vmem:[#allocation2 + $0x67] sm:$0xff] }
 0x114   : > { %v1719_v17 = vadd.f32 %v1687_v58, %v1619_v57  ;;  %v1787_v21 = vmul.f32 %v3005_v25, %v1152_v45  ;;  %v1788_v22 = vmul.f32 %v3005_v25, %v1153_v53  ;;  %v1188_v36 = vmul.f32 %v2938_v61, %v1152_v45  ;;  %v1155_v43 = vld [vmem:[#allocation2 + $0x71] sm:$0xff] }
 0x115   : > { %v1720_v9 = vadd.f32 %v1688_v0, %v1620_v7  ;;  %v3084_v27 = vmul.f32 %v2924_v41, %v3067_v46  ;;  %v1189_v33 = vmul.f32 %v2938_v61, %v1153_v53  ;;  %v1419_v24 = vadd.f32 %v1387_v62, %v1319_v48  ;;  %v1054_v0 = vld [vmem:[#allocation2 + $0x68] sm:$0xff] }
 0x116   : > { %v1486_v35 = vmul.f32 %v2986_v4, %v1152_v45  ;;  %v1819_v47 = vadd.f32 %v1787_v21, %v1719_v17  ;;  %v1487_v56 = vmul.f32 %v2986_v4, %v1153_v53  ;;  %v1121_v57 = vadd.f32 %v1089_v37, %v989_v2  ;;  %v1154_v21 = vld [vmem:[#allocation2 + $0x69] sm:$0xff] }
 0x117   : > { %v1220_v58 = vadd.f32 %v1188_v36, %v1120_v5  ;;  %v1820_v1 = vadd.f32 %v1788_v22, %v1720_v9  ;;  %v1091_v44 = vmul.f32 %v2924_v41, %v1055_v30  ;;  %v1288_v20 = vmul.f32 %v2989_v12, %v954_v3 }
 0x118   : > { %v1518_v7 = vadd.f32 %v1486_v35, %v1418_v16  ;;  %v1857_v13 = vadd.f32 %v3079_v6, %v1819_v47  ;;  %v3094_v45 = vmul.f32 %v2938_v61, %v1155_v43  ;;  %v1690_v53 = vmul.f32 %v3002_v23, %v1055_v30 }
 0x119   : > { %v1858_v48 = vadd.f32 %v3079_v6, %v1820_v1  ;;  %v990_v37 = vmul.f32 %v2927_v42, %v954_v3  ;;  %v1090_v5 = vmul.f32 %v2924_v41, %v1054_v0  ;;  %v1519_v62 = vadd.f32 %v1487_v56, %v1419_v24 }
 0x11a   : > { %4178 = vst [vmem:[#allocation24_spill] sm:$0xff] %v3094_v45  ;;  %v1889_v2 = vadd.f32 3.0, %v1857_v13  ;;  %v1589_v16 = vmul.f32 %v3011_v31, %v954_v3  ;;  %v1221_v22 = vadd.f32 %v1189_v33, %v1121_v57  ;;  %v1289_v1 = vmul.f32 %v2989_v12, %v955_v29 }
 0x11b   : > { %v1890_v17 = vadd.f32 3.0, %v1858_v48  ;;  %v1590_v36 = vmul.f32 %v3011_v31, %v955_v29  ;;  %v1320_v35 = vadd.f32 %v1288_v20, %v1220_v58  ;;  %v1689_v15 = vmul.f32 %v3002_v23, %v1054_v0 }
 0x11c   : > { %v1921_v9 = vmax.f32 %v1889_v2, 0.0  ;;  %v1621_v47 = vadd.f32 %v1589_v16, %v1518_v7  ;;  %v1790_v24 = vmul.f32 %v3005_v25, %v1155_v43  ;;  %v991_v3 = vmul.f32 %v2927_v42, %v955_v29 }
 0x11d   : > { %v1922_v59 = vmax.f32 %v1890_v17, 0.0  ;;  %v1622_v56 = vadd.f32 %v1590_v36, %v1519_v62  ;;  %v1388_v63 = vmul.f32 %v2983_v8, %v1054_v0  ;;  %v1789_v57 = vmul.f32 %v3005_v25, %v1154_v21  ;;  %v1167_v0 = vld [vmem:[#allocation2 + $0x131] sm:$0xff] }
 0x11e   : > { %v1953_v54 = vmin.f32 %v1921_v9, 6.0  ;;  %v1721_v33 = vadd.f32 %v1689_v15, %v1621_v47  ;;  %v1122_v45 = vadd.f32 %v1090_v5, %v990_v37  ;;  %v1321_v2 = vadd.f32 %v1289_v1, %v1221_v22  ;;  %v3149_v1 = vld [vmem:[#allocation2 + $0x12f] sm:$0xff] }
 0x11f   : > { %v1954_v55 = vmin.f32 %v1922_v59, 6.0  ;;  %v1722_v20 = vadd.f32 %v1690_v53, %v1622_v56  ;;  %v1389_v7 = vmul.f32 %v2983_v8, %v1055_v30  ;;  %v1420_v16 = vadd.f32 %v1388_v63, %v1320_v35  ;;  %v3151_v35 = vld [vmem:[#allocation2 + $0x128] sm:$0xff] }
 0x120   : > { %v1985_v58 = vmul.f32 0.16666667, %v1953_v54  ;;  %v1821_v17 = vadd.f32 %v1789_v57, %v1721_v33  ;;  %v3113_v29 = vmul.f32 %v2986_v4, %v1155_v43  ;;  %v1190_v62 = vmul.f32 %v2938_v61, %v1154_v21 }
 0x121   : > { %v1986_v31 = vmul.f32 0.16666667, %v1954_v55  ;;  %v1822_v36 = vadd.f32 %v1790_v24, %v1722_v20  ;;  %v3116_v9 = vadd.f32 %v1091_v44, %v991_v3  ;;  %v1488_v59 = vmul.f32 %v2986_v4, %v1154_v21 }
 0x122   : > { %v2017_v15 = vmul.f32 %v1985_v58, %v1857_v13  ;;  %v1859_v53 = vadd.f32 %v3079_v6, %v1821_v17  ;;  %v3120_v37 = vadd.f32 %v1190_v62, %v1122_v45  ;;  %v3122_v63 = vadd.f32 %v1389_v7, %v1321_v2  ;;  %v3162_v2 = vld [vmem:[#allocation2 + $0x129] sm:$0xff] }
 0x123   : > { %v2018_v54 = vmul.f32 %v1986_v31, %v1858_v48  ;;  %v1860_v55 = vadd.f32 %v3079_v6, %v1822_v36  ;;  %v3130_v13 = vadd.f32 %v1488_v59, %v1420_v16  ;;  %v3133_v43 = vmul.f32 %v2938_v61, %v1167_v0  ;;  %v3135_v31 = vld [vmem:[#allocation2 + $0x127] sm:$0xff]  ;;  %v3137_v48 = vpop.f32.mrb[11].mxu1 }
 0x124   : > { %2050 = vst.msk [vmem:[%s3125_s16] sm:$0xff] %vm338_vm0, %v2017_v15  ;;  %v2082_v44 = vsel %vm338_vm0, %v2017_v15, 0.0  ;;  %v1891_v30 = vadd.f32 3.0, %v1859_v53  ;;  %4179 = vst [vmem:[#allocation25_spill] sm:$0xff] %v3137_v48  ;;  %v3144_v21 = vmul.f32 %v2983_v8, %v3067_v46  ;;  %v3147_v22 = vmul.f32 %v2986_v4, %v1167_v0 }
 0x125   : > { %2051 = vst.msk [vmem:[%s3125_s16 + $0x8] sm:$0xff] %vm338_vm0, %v2018_v54  ;;  %v2083_v45 = vsel %vm338_vm0, %v2018_v54, 0.0  ;;  %v1892_v5 = vadd.f32 3.0, %v1860_v55  ;;  %v3155_v3 = vmul.f32 %v3002_v23, %v3067_v46  ;;  %v3158_v56 = vmul.f32 %v3005_v25, %v1167_v0 }
 0x126   : > { %4180 = vst [vmem:[#allocation26_spill] sm:$0xff] %v3144_v21  ;;  %4181 = vst [vmem:[#allocation27_spill] sm:$0xff] %v3147_v22  ;;  %v2084_v47 = vadd.f32 %v2083_v45, %v2082_v44  ;;  %v1923_v24 = vmax.f32 %v1891_v30, 0.0  ;;  %v1002_v57 = vmul.f32 %v2927_v42, %v3135_v31  ;;  %v848_v20 = vmul.f32 0.16666667, %v3039_v11 }
 0x127   : > { %4182 = vst [vmem:[#allocation28_spill] sm:$0xff] %v3155_v3  ;;  %4183 = vst [vmem:[#allocation29_spill] sm:$0xff] %v3158_v56  ;;  %v1924_v33 = vmax.f32 %v1892_v5, 0.0  ;;  %v847_v58 = vmul.f32 0.16666667, %v3056_v38  ;;  %v1003_v16 = vmul.f32 %v2927_v42, %v3149_v1  ;;  %v1102_v46 = vmul.f32 %v2924_v41, %v3151_v35 }
 0x128   : > { %v1955_v7 = vmin.f32 %v1923_v24, 6.0  ;;  %v860_v17 = vmul.f32 0.16666667, %v3041_v18  ;;  %v880_v36 = vmul.f32 %v848_v20, %v2954_v50  ;;  %v859_v15 = vmul.f32 0.16666667, %v3058_v40  ;;  %v3186_v40 = vpop.f32.mrb[12].mxu1 }
 0x129   : > { %v1956_v62 = vmin.f32 %v1924_v33, 6.0  ;;  %v879_v0 = vmul.f32 %v847_v58, %v2965_v52  ;;  %v1202_v11 = vmul.f32 %v2938_v61, %v3162_v2  ;;  %v786_v54 = vmax.f32 %v3045_v19, 0.0  ;;  %4184 = vst [vmem:[#allocation30_spill] sm:$0xff] %v3186_v40  ;;  %v3203_v5 = vpop.f32.mrb[13].mxu1 }
 0x12a   : > { %v1987_v59 = vmul.f32 0.16666667, %v1955_v7  ;;  %v892_v38 = vmul.f32 %v860_v17, %v2968_v60  ;;  %915 = vst.msk [vmem:[#allocation2 + $0x90] sm:$0xff] %vm338_vm0, %v880_v36  ;;  %v891_v50 = vmul.f32 %v859_v15, %v2980_v10  ;;  %v785_v52 = vmax.f32 %v3063_v51, 0.0  ;;  %4185 = vst [vmem:[#allocation31_spill] sm:$0xff] %v3203_v5 }
 0x12b   : > { %v1988_v44 = vmul.f32 0.16666667, %v1956_v62  ;;  %914 = vst.msk [vmem:[#allocation2 + $0x88] sm:$0xff] %vm338_vm0, %v879_v0  ;;  %v3184_v18 = vadd.f32 %v2948_v26, %v2921_v39  ;;  %v818_v60 = vmin.f32 %v786_v54, 6.0  ;;  %v3191_v19 = vadd.f32 %v2921_v39, %v2950_v32 }
 0x12c   : > { %v2019_v30 = vmul.f32 %v1987_v59, %v1859_v53  ;;  %927 = vst.msk [vmem:[#allocation2 + $0x150] sm:$0xff] %vm338_vm0, %v892_v38  ;;  %v3195_v10 = vadd.f32 %v3007_v28, %v2921_v39  ;;  %926 = vst.msk [vmem:[#allocation2 + $0x148] sm:$0xff] %vm338_vm0, %v891_v50  ;;  %v817_v26 = vmin.f32 %v785_v52, 6.0  ;;  %v3201_v53 = vadd.f32 %v2921_v39, %v3015_v34 }
 0x12d   : > { %v2020_v51 = vmul.f32 %v1988_v44, %v1860_v55  ;;  %v766_v45 = vadd.f32 3.0, %v3184_v18  ;;  %v850_v24 = vmul.f32 0.16666667, %v818_v60  ;;  %v765_v28 = vadd.f32 3.0, %v3191_v19 }
 0x12e   : > { %2052 = vst.msk [vmem:[%s3125_s16 + $0x10] sm:$0xff] %vm338_vm0, %v2019_v30  ;;  %v2085_v32 = vsel %vm338_vm0, %v2019_v30, 0.0  ;;  %v756_v55 = vadd.f32 3.0, %v3195_v10  ;;  %v1134_v20 = vadd.f32 %v1102_v46, %v1002_v57  ;;  %v1135_v58 = vadd.f32 %v3084_v27, %v1003_v16  ;;  %v4190_v16 = vld [vmem:[#allocation18_spill] sm:$0xff] }
 0x12f   : > { %2053 = vst.msk [vmem:[%s3125_s16 + $0x18] sm:$0xff] %vm338_vm0, %v2020_v51  ;;  %v2086_v33 = vadd.f32 %v2085_v32, %v2084_v47  ;;  %v849_v7 = vmul.f32 0.16666667, %v817_v26  ;;  %v3215_v34 = vmul.f32 %v2989_v12, %v3135_v31  ;;  %v2087_v17 = vsel %vm338_vm0, %v2020_v51, 0.0 }
 0x130   : > { %v882_v62 = vmul.f32 %v850_v24, %v3025_v49  ;;  %v798_v36 = vmax.f32 %v766_v45, 0.0  ;;  %v797_v59 = vmax.f32 %v765_v28, 0.0  ;;  %v788_v38 = vmax.f32 %v756_v55, 0.0 }
 0x131   : > { %4186 = vst [vmem:[#allocation32_spill] sm:$0xff] %v3215_v34  ;;  %v3219_v0 = vadd.f32 %v2087_v17, %v2086_v33  ;;  %v881_v15 = vmul.f32 %v849_v7, %v3037_v14  ;;  %v3224_v47 = vmul.f32 %v2989_v12, %v3149_v1  ;;  %v3228_v27 = vmul.f32 %v2983_v8, %v3151_v35  ;;  %v1057_v50 = vld [vmem:[#allocation2 + $0x90] sm:$0xff] }
 0x132   : > { %v3232_v57 = vmul.f32 %v2986_v4, %v3162_v2  ;;  %917 = vst.msk [vmem:[#allocation2 + $0xb0] sm:$0xff] %vm338_vm0, %v882_v62  ;;  %v3236_v49 = vadd.f32 3.0, %v3201_v53  ;;  %v3238_v14 = vadd.f32 %v1202_v11, %v1134_v20  ;;  %v3242_v46 = vmul.f32 %v4190_v16, %v3135_v31  ;;  %v956_v52 = vld [vmem:[#allocation2 + $0x87] sm:$0xff]  ;;  %v957_v30 = vld [vmem:[#allocation2 + $0x8f] sm:$0xff]  ;;  %v4195_v31 = vld [vmem:[#allocation24_spill] sm:$0xff] }
 0x133   : > { %4187 = vst [vmem:[#allocation33_spill] sm:$0xff] %v3224_v47  ;;  %4188 = vst [vmem:[#allocation34_spill] sm:$0xff] %v3228_v27  ;;  %v3246_v54 = vmul.f32 %v4190_v16, %v3149_v1  ;;  %v3250_v44 = vmul.f32 %v3002_v23, %v3151_v35  ;;  %v3255_v11 = vmul.f32 %v3005_v25, %v3162_v2  ;;  %v1056_v35 = vld [vmem:[#allocation2 + $0x88] sm:$0xff]  ;;  %v3264_v26 = vmin.f32 %v798_v36, 6.0  ;;  %v4196_v2 = vld [vmem:[#allocation12_spill] sm:$0xff] }
 0x134   : > { %4189 = vst [vmem:[#allocation35_spill] sm:$0xff] %v3232_v57  ;;  %4191 = vst [vmem:[#allocation36_spill] sm:$0xff] %v3242_v46  ;;  %v1223_v60 = vadd.f32 %v4195_v31, %v3116_v9  ;;  %v1521_v1 = vadd.f32 %v3113_v29, %v3122_v63  ;;  %v3262_v51 = vadd.f32 %v3133_v43, %v1135_v58  ;;  %v3266_v45 = vmin.f32 %v797_v59, 6.0  ;;  %v1157_v9 = vld [vmem:[#allocation2 + $0x91] sm:$0xff]  ;;  %v4197_v63 = vld [vmem:[#allocation13_spill] sm:$0xff] }
 0x135   : > { %4192 = vst [vmem:[#allocation37_spill] sm:$0xff] %v3246_v54  ;;  %4193 = vst [vmem:[#allocation38_spill] sm:$0xff] %v3250_v44  ;;  %v3268_v32 = vmin.f32 %v788_v38, 6.0  ;;  %v3272_v24 = vadd.f32 %v4196_v2, %v2921_v39  ;;  %v1093_v28 = vmul.f32 %v2924_v41, %v1057_v50  ;;  %v1591_v55 = vmul.f32 %v4190_v16, %v956_v52  ;;  %v1156_v58 = vld [vmem:[#allocation2 + $0x89] sm:$0xff] }
 0x136   : > { %916 = vst.msk [vmem:[#allocation2 + $0xa8] sm:$0xff] %vm338_vm0, %v881_v15  ;;  %4194 = vst [vmem:[#allocation39_spill] sm:$0xff] %v3255_v11  ;;  %v3279_v43 = vadd.f32 %v2921_v39, %v4197_v63  ;;  %v992_v33 = vmul.f32 %v2927_v42, %v956_v52  ;;  %v993_v20 = vmul.f32 %v2927_v42, %v957_v30  ;;  %v968_v11 = vld [vmem:[#allocation2 + $0x147] sm:$0xff]  ;;  %v1069_v57 = vld [vmem:[#allocation2 + $0x150] sm:$0xff] }
 0x137   : > { %v1290_v7 = vmul.f32 %v2989_v12, %v956_v52  ;;  %v1592_v17 = vmul.f32 %v4190_v16, %v957_v30  ;;  %v1092_v62 = vmul.f32 %v2924_v41, %v1056_v35  ;;  %v1291_v36 = vmul.f32 %v2989_v12, %v957_v30 }
 0x138   : > { %v1623_v15 = vadd.f32 %v1591_v55, %v3130_v13  ;;  %v1691_v59 = vmul.f32 %v3002_v23, %v1056_v35  ;;  %v3290_v38 = vmul.f32 %v2938_v61, %v1157_v9  ;;  %v1391_v31 = vmul.f32 %v2983_v8, %v1057_v50  ;;  %v1068_v13 = vld [vmem:[#allocation2 + $0x148] sm:$0xff] }
 0x139   : > { %v1692_v2 = vmul.f32 %v3002_v23, %v1057_v50  ;;  %v1624_v63 = vadd.f32 %v1592_v17, %v1521_v1  ;;  %v3295_v52 = vmul.f32 %v2986_v4, %v1157_v9  ;;  %v1792_v29 = vmul.f32 %v3005_v25, %v1157_v9  ;;  %v969_v50 = vld [vmem:[#allocation2 + $0x14f] sm:$0xff]  ;;  %v3304_v9 = vpop.f32.mrb[14].mxu1 }
 0x13a   : > { %v1723_v56 = vadd.f32 %v1691_v59, %v1623_v15  ;;  %v1791_v30 = vmul.f32 %v3005_v25, %v1156_v58  ;;  %v3299_v55 = vadd.f32 %v1093_v28, %v993_v20  ;;  %v1192_v3 = vmul.f32 %v2938_v61, %v1156_v58  ;;  %4198 = vst [vmem:[#allocation24_spill] sm:$0xff] %v3304_v9  ;;  %v3337_v9 = vld [vmem:[#allocation2 + $0xb1] sm:$0xff] }
 0x13b   : > { %v1322_v44 = vadd.f32 %v1290_v7, %v3120_v37  ;;  %v1724_v22 = vadd.f32 %v1692_v2, %v1624_v63  ;;  %v1124_v1 = vadd.f32 %v1092_v62, %v992_v33  ;;  %v1323_v17 = vadd.f32 %v1291_v36, %v1223_v60  ;;  %v1169_v33 = vld [vmem:[#allocation2 + $0x151] sm:$0xff]  ;;  %v1168_v60 = vld [vmem:[#allocation2 + $0x149] sm:$0xff] }
 0x13c   : > { %v1390_v54 = vmul.f32 %v2983_v8, %v1056_v35  ;;  %v1823_v46 = vadd.f32 %v1791_v30, %v1723_v56  ;;  %v1004_v59 = vmul.f32 %v2927_v42, %v968_v11  ;;  %v1104_v28 = vmul.f32 %v2924_v41, %v1068_v13 }
 0x13d   : > { %v1824_v15 = vadd.f32 %v1792_v29, %v1724_v22  ;;  %v1302_v20 = vmul.f32 %v2989_v12, %v968_v11  ;;  %v1490_v21 = vmul.f32 %v2986_v4, %v1156_v58  ;;  %v1105_v7 = vmul.f32 %v2924_v41, %v1069_v57 }
 0x13e   : > { %v1861_v37 = vadd.f32 %v3079_v6, %v1823_v46  ;;  %v1303_v35 = vmul.f32 %v2989_v12, %v969_v50  ;;  %v1422_v56 = vadd.f32 %v1390_v54, %v1322_v44  ;;  %v1402_v29 = vmul.f32 %v2983_v8, %v1068_v13 }
 0x13f   : > { %v1862_v62 = vadd.f32 %v3079_v6, %v1824_v15  ;;  %v1334_v22 = vadd.f32 %v1302_v20, %v3238_v14  ;;  %v3316_v36 = vadd.f32 %v1192_v3, %v1124_v1  ;;  %v1423_v2 = vadd.f32 %v1391_v31, %v1323_v17 }
 0x140   : > { %v1893_v63 = vadd.f32 3.0, %v1861_v37  ;;  %v1005_v58 = vmul.f32 %v2927_v42, %v969_v50  ;;  %v3320_v30 = vmul.f32 %v2938_v61, %v1169_v33  ;;  %v1136_v27 = vadd.f32 %v1104_v28, %v1004_v59 }
 0x141   : > { %v1894_v46 = vadd.f32 3.0, %v1862_v62  ;;  %v1204_v47 = vmul.f32 %v2938_v61, %v1168_v60  ;;  %v1403_v44 = vmul.f32 %v2983_v8, %v1069_v57  ;;  %v3325_v14 = vmul.f32 %v2986_v4, %v1169_v33 }
 0x142   : > { %v1925_v54 = vmax.f32 %v1893_v63, 0.0  ;;  %v1335_v3 = vadd.f32 %v1303_v35, %v3262_v51  ;;  %v1522_v1 = vadd.f32 %v1490_v21, %v1422_v56  ;;  %v1434_v17 = vadd.f32 %v1402_v29, %v1334_v22  ;;  %v1059_v63 = vld [vmem:[#allocation2 + $0xb0] sm:$0xff]  ;;  %v958_v56 = vld [vmem:[#allocation2 + $0xa7] sm:$0xff]  ;;  %v3355_v22 = vpop.f32.mrb[15].mxu1 }
 0x143   : > { %v1926_v31 = vmax.f32 %v1894_v46, 0.0  ;;  %v1502_v15 = vmul.f32 %v2986_v4, %v1168_v60  ;;  %v3330_v34 = vmul.f32 %v3002_v23, %v1069_v57  ;;  %v3333_v59 = vmul.f32 %v3005_v25, %v1169_v33  ;;  %4205 = vst [vmem:[#allocation44_spill] sm:$0xff] %v3355_v22  ;;  %v959_v29 = vld [vmem:[#allocation2 + $0xaf] sm:$0xff] }
 0x144   : > { %v1957_v20 = vmin.f32 %v1925_v54, 6.0  ;;  %v3335_v28 = vadd.f32 %v1105_v7, %v1005_v58  ;;  %v3339_v40 = vadd.f32 %v1204_v47, %v1136_v27  ;;  %v3342_v21 = vmul.f32 %v4190_v16, %v968_v11  ;;  %v1058_v54 = vld [vmem:[#allocation2 + $0xa8] sm:$0xff] }
 0x145   : > { %4199 = vst [vmem:[#allocation12_spill] sm:$0xff] %v3330_v34  ;;  %4200 = vst [vmem:[#allocation13_spill] sm:$0xff] %v3333_v59  ;;  %v1958_v5 = vmin.f32 %v1926_v31, 6.0  ;;  %v3345_v51 = vmul.f32 %v4190_v16, %v969_v50  ;;  %v3347_v57 = vadd.f32 %v1403_v44, %v1335_v3  ;;  %v3350_v33 = vmul.f32 %v3002_v23, %v1068_v13 }
 0x146   : > { %4201 = vst [vmem:[#allocation40_spill] sm:$0xff] %v3342_v21  ;;  %v1989_v35 = vmul.f32 0.16666667, %v1957_v20  ;;  %v3353_v7 = vmul.f32 %v3005_v25, %v1168_v60  ;;  %v3357_v27 = vadd.f32 %v1502_v15, %v1434_v17  ;;  %v1095_v11 = vmul.f32 %v2924_v41, %v1059_v63  ;;  %v1158_v15 = vld [vmem:[#allocation2 + $0xa9] sm:$0xff] }
 0x147   : > { %4202 = vst [vmem:[#allocation41_spill] sm:$0xff] %v3345_v51  ;;  %4203 = vst [vmem:[#allocation42_spill] sm:$0xff] %v3350_v33  ;;  %v1990_v47 = vmul.f32 0.16666667, %v1958_v5  ;;  %v3362_v50 = vmul.f32 %v2938_v61, %v3337_v9  ;;  %v1393_v58 = vmul.f32 %v2983_v8, %v1059_v63  ;;  %v1694_v60 = vmul.f32 %v3002_v23, %v1059_v63 }
 0x148   : > { %4204 = vst [vmem:[#allocation43_spill] sm:$0xff] %v3353_v7  ;;  %v2021_v13 = vmul.f32 %v1989_v35, %v1861_v37  ;;  %v1794_v46 = vmul.f32 %v3005_v25, %v3337_v9  ;;  %v994_v44 = vmul.f32 %v2927_v42, %v958_v56  ;;  %v1523_v3 = vadd.f32 %v3295_v52, %v1423_v2 }
 0x149   : > { %v2022_v5 = vmul.f32 %v1990_v47, %v1862_v62  ;;  %v1593_v31 = vmul.f32 %v4190_v16, %v958_v56  ;;  %v995_v37 = vmul.f32 %v2927_v42, %v959_v29  ;;  %v1225_v20 = vadd.f32 %v3290_v38, %v3299_v55 }
 0x14a   : > { %2054 = vst.msk [vmem:[%s3125_s16 + $0x20] sm:$0xff] %vm338_vm0, %v2021_v13  ;;  %v2089_v17 = vsel %vm338_vm0, %v2021_v13, 0.0  ;;  %v1594_v63 = vmul.f32 %v4190_v16, %v959_v29  ;;  %v1292_v52 = vmul.f32 %v2989_v12, %v958_v56  ;;  %v1693_v35 = vmul.f32 %v3002_v23, %v1058_v54 }
 0x14b   : > { %2055 = vst.msk [vmem:[%s3125_s16 + $0x28] sm:$0xff] %vm338_vm0, %v2022_v5  ;;  %v2090_v62 = vadd.f32 %v2089_v17, %v3219_v0  ;;  %v1625_v2 = vadd.f32 %v1593_v31, %v1522_v1  ;;  %v1293_v47 = vmul.f32 %v2989_v12, %v959_v29  ;;  %v2091_v22 = vsel %vm338_vm0, %v2022_v5, 0.0 }
 0x14c   : > { %v1626_v13 = vadd.f32 %v1594_v63, %v1523_v3  ;;  %v862_v59 = vmul.f32 0.16666667, %v3264_v26  ;;  %v1793_v38 = vmul.f32 %v3005_v25, %v1158_v15  ;;  %v861_v34 = vmul.f32 0.16666667, %v3266_v45 }
 0x14d   : > { %v1725_v7 = vadd.f32 %v1693_v35, %v1625_v2  ;;  %v3387_v55 = vadd.f32 %v2091_v22, %v2090_v62  ;;  %v1094_v0 = vmul.f32 %v2924_v41, %v1058_v54  ;;  %v852_v31 = vmul.f32 0.16666667, %v3268_v32 }
 0x14e   : > { %v1726_v56 = vadd.f32 %v1694_v60, %v1626_v13  ;;  %v894_v1 = vmul.f32 %v862_v59, %v3184_v18  ;;  %v1324_v29 = vadd.f32 %v1292_v52, %v3316_v36  ;;  %v893_v5 = vmul.f32 %v861_v34, %v3191_v19 }
 0x14f   : > { %v1825_v3 = vadd.f32 %v1793_v38, %v1725_v7  ;;  %v4206_v26 = vmax.f32 %v3236_v49, 0.0  ;;  %v1392_v22 = vmul.f32 %v2983_v8, %v1058_v54  ;;  %v884_v45 = vmul.f32 %v852_v31, %v3195_v10  ;;  %v4207_v7 = vld [vmem:[#allocation19_spill] sm:$0xff] }
 0x150   : > { %v1826_v63 = vadd.f32 %v1794_v46, %v1726_v56  ;;  %929 = vst.msk [vmem:[#allocation2 + $0x170] sm:$0xff] %vm338_vm0, %v894_v1  ;;  %v768_v60 = vadd.f32 3.0, %v3272_v24  ;;  %v1325_v18 = vadd.f32 %v1293_v47, %v1225_v20  ;;  %928 = vst.msk [vmem:[#allocation2 + $0x168] sm:$0xff] %vm338_vm0, %v893_v5  ;;  %v767_v19 = vadd.f32 3.0, %v3279_v43  ;;  %v4208_v47 = vld [vmem:[#allocation20_spill] sm:$0xff]  ;;  %v4209_v31 = vld [vmem:[#allocation15_spill] sm:$0xff] }
 0x151   : > { %v819_v17 = vmin.f32 %v4206_v26, 6.0  ;;  %v1863_v32 = vadd.f32 %v3079_v6, %v1825_v3  ;;  %v1194_v34 = vmul.f32 %v2938_v61, %v1158_v15  ;;  %919 = vst.msk [vmem:[#allocation2 + $0xd0] sm:$0xff] %vm338_vm0, %v884_v45  ;;  %v3409_v10 = vadd.f32 %v4207_v7, %v2921_v39 }
 0x152   : > { %v1864_v49 = vadd.f32 %v3079_v6, %v1826_v63  ;;  %v800_v59 = vmax.f32 %v768_v60, 0.0  ;;  %v1126_v46 = vadd.f32 %v1094_v0, %v994_v44  ;;  %v1424_v54 = vadd.f32 %v1392_v22, %v1324_v29 }
 0x153   : > { %v851_v36 = vmul.f32 0.16666667, %v819_v17  ;;  %v1895_v20 = vadd.f32 3.0, %v1863_v32  ;;  %v1127_v52 = vadd.f32 %v1095_v11, %v995_v37  ;;  %v1492_v2 = vmul.f32 %v2986_v4, %v1158_v15 }
 0x154   : > { %v1896_v35 = vadd.f32 3.0, %v1864_v49  ;;  %v3415_v13 = vadd.f32 %v2921_v39, %v4208_v47  ;;  %v1425_v38 = vadd.f32 %v1393_v58, %v1325_v18  ;;  %v799_v1 = vmax.f32 %v767_v19, 0.0 }
 0x155   : > { %v883_v62 = vmul.f32 %v851_v36, %v3201_v53  ;;  %v1927_v56 = vmax.f32 %v1895_v20, 0.0  ;;  %v3420_v44 = vadd.f32 %v4209_v31, %v2921_v39  ;;  %v1493_v53 = vmul.f32 %v2986_v4, %v3337_v9 }
 0x156   : > { %v1928_v11 = vmax.f32 %v1896_v35, 0.0  ;;  %v832_v37 = vmin.f32 %v800_v59, 6.0  ;;  %v758_v15 = vadd.f32 3.0, %v3409_v10  ;;  %v3425_v0 = vadd.f32 %v1194_v34, %v1126_v46 }
 0x157   : > { %918 = vst.msk [vmem:[#allocation2 + $0xc8] sm:$0xff] %vm338_vm0, %v883_v62  ;;  %v3427_v29 = vadd.f32 %v1492_v2, %v1424_v54  ;;  %v1959_v58 = vmin.f32 %v1927_v56, 6.0  ;;  %v1237_v3 = vadd.f32 %v3320_v30, %v3335_v28  ;;  %v970_v26 = vld [vmem:[#allocation2 + $0x167] sm:$0xff]  ;;  %v1535_v39 = vadd.f32 %v3325_v14, %v3347_v57  ;;  %v1071_v45 = vld [vmem:[#allocation2 + $0x170] sm:$0xff]  ;;  %v3449_v57 = vld [vmem:[%s4135_s2] ss:$0 sm:$0xff] }
 0x158   : > { %v1960_v5 = vmin.f32 %v1928_v11, 6.0  ;;  %v1070_v17 = vld [vmem:[#allocation2 + $0x168] sm:$0xff]  ;;  %v3434_v9 = vadd.f32 %v3362_v50, %v1127_v52  ;;  %v3437_v22 = vadd.f32 3.0, %v3415_v13  ;;  %v3439_v18 = vadd.f32 %v1493_v53, %v1425_v38  ;;  %4210 = vst [vmem:[#allocation19_spill] sm:$0xff] %v3449_v57  ;;  %v4211_v50 = vld [vmem:[#allocation16_spill] sm:$0xff]  ;;  %v1171_v2 = vld [vmem:[#allocation2 + $0x171] sm:$0xff] }
 0x159   : > { %v1991_v63 = vmul.f32 0.16666667, %v1959_v58  ;;  %v971_v60 = vld [vmem:[#allocation2 + $0x16f] sm:$0xff]  ;;  %v831_v36 = vmin.f32 %v799_v1, 6.0  ;;  %v3442_v30 = vadd.f32 3.0, %v3420_v44  ;;  %v790_v14 = vmax.f32 %v758_v15, 0.0 }
 0x15a   : > { %v1992_v28 = vmul.f32 0.16666667, %v1960_v5  ;;  %v3444_v19 = vmul.f32 0.16666667, %v832_v37  ;;  %v3453_v34 = vadd.f32 %v3449_v57, %v4211_v50  ;;  %v1006_v7 = vmul.f32 %v2927_v42, %v970_v26  ;;  %v1170_v54 = vld [vmem:[#allocation2 + $0x169] sm:$0xff] }
 0x15b   : > { %v2023_v59 = vmul.f32 %v1991_v63, %v1863_v32  ;;  %v1106_v46 = vmul.f32 %v2924_v41, %v1070_v17  ;;  %v1304_v20 = vmul.f32 %v2989_v12, %v970_v26  ;;  %v1107_v52 = vmul.f32 %v2924_v41, %v1071_v45 }
 0x15c   : > { %v3458_v62 = vmul.f32 %v1992_v28, %v1864_v49  ;;  %v1405_v35 = vmul.f32 %v2983_v8, %v1071_v45  ;;  %v1305_v47 = vmul.f32 %v2989_v12, %v971_v60  ;;  %v1706_v38 = vmul.f32 %v3002_v23, %v1071_v45 }
 0x15d   : > { %2056 = vst.msk [vmem:[%s3125_s16 + $0x30] sm:$0xff] %vm338_vm0, %v2023_v59  ;;  %v2093_v32 = vsel %vm338_vm0, %v2023_v59, 0.0  ;;  %v1806_v56 = vmul.f32 %v3005_v25, %v1171_v2  ;;  %v1007_v1 = vmul.f32 %v2927_v42, %v971_v60  ;;  %v1206_v31 = vmul.f32 %v2938_v61, %v1170_v54 }
 0x15e   : > { %2057 = vst.msk [vmem:[%s3125_s16 + $0x38] sm:$0xff] %vm338_vm0, %v3458_v62  ;;  %v2094_v49 = vadd.f32 %v2093_v32, %v3387_v55  ;;  %v1605_v53 = vmul.f32 %v4190_v16, %v970_v26  ;;  %v1606_v11 = vmul.f32 %v4190_v16, %v971_v60  ;;  %v1138_v37 = vadd.f32 %v1106_v46, %v1006_v7  ;;  %v1061_v46 = vld [vmem:[#allocation2 + $0xd0] sm:$0xff] }
 0x15f   : > { %v1336_v15 = vadd.f32 %v1304_v20, %v3339_v40  ;;  %v1404_v58 = vmul.f32 %v2983_v8, %v1070_v17  ;;  %v1705_v5 = vmul.f32 %v3002_v23, %v1070_v17  ;;  %v1337_v63 = vadd.f32 %v1305_v47, %v1237_v3  ;;  %v3486_v20 = vld [vmem:[#allocation2 + $0xd1] sm:$0xff]  ;;  %v4212_v3 = vld [vmem:[#allocation21_spill] sm:$0xff] }
 0x160   : > { %v1637_v45 = vadd.f32 %v1605_v53, %v3357_v27  ;;  %v1638_v28 = vadd.f32 %v1606_v11, %v1535_v39  ;;  %v1805_v50 = vmul.f32 %v3005_v25, %v1170_v54  ;;  %v863_v55 = vmul.f32 0.16666667, %v831_v36 }
 0x161   : > { %v822_v59 = vmin.f32 %v790_v14, 6.0  ;;  %v789_v32 = vmax.f32 %v3437_v22, 0.0  ;;  %v3484_v60 = vmul.f32 %v2938_v61, %v1171_v2  ;;  %v3490_v27 = vadd.f32 %v3449_v57, %v4212_v3  ;;  %v960_v14 = vld [vmem:[#allocation2 + $0xc7] sm:$0xff] }
 0x162   : > { %v1737_v40 = vadd.f32 %v1705_v5, %v1637_v45  ;;  %v1738_v7 = vadd.f32 %v1706_v38, %v1638_v28  ;;  %v3493_v17 = vmul.f32 %v2986_v4, %v1171_v2  ;;  %v3495_v39 = vadd.f32 %v1107_v52, %v1007_v1  ;;  %v961_v5 = vld [vmem:[#allocation2 + $0xcf] sm:$0xff] }
 0x163   : > { %v3497_v22 = vadd.f32 %v1206_v31, %v1138_v37  ;;  %v3500_v36 = vmul.f32 %v2986_v4, %v1170_v54  ;;  %v3502_v47 = vadd.f32 %v1404_v58, %v1336_v15  ;;  %v3504_v38 = vadd.f32 %v1405_v35, %v1337_v63  ;;  %v1060_v45 = vld [vmem:[#allocation2 + $0xc8] sm:$0xff] }
 0x164   : > { %v1837_v53 = vadd.f32 %v1805_v50, %v1737_v40  ;;  %v1838_v11 = vadd.f32 %v1806_v56, %v1738_v7  ;;  %v1097_v28 = vmul.f32 %v2924_v41, %v1061_v46  ;;  %v1395_v2 = vmul.f32 %v2983_v8, %v1061_v46  ;;  %v1160_v37 = vld [vmem:[#allocation2 + $0xc9] sm:$0xff] }
 0x165   : > { %4213 = vst [vmem:[#allocation20_spill] sm:$0xff] %v3497_v22  ;;  %v1696_v52 = vmul.f32 %v3002_v23, %v1061_v46  ;;  %v1796_v1 = vmul.f32 %v3005_v25, %v3486_v20  ;;  %v996_v35 = vmul.f32 %v2927_v42, %v960_v14  ;;  %v1595_v56 = vmul.f32 %v4190_v16, %v960_v14 }
 0x166   : > { %v1875_v54 = vadd.f32 %v3079_v6, %v1837_v53  ;;  %v1876_v31 = vadd.f32 %v3079_v6, %v1838_v11  ;;  %v997_v15 = vmul.f32 %v2927_v42, %v961_v5  ;;  %v1096_v58 = vmul.f32 %v2924_v41, %v1060_v45 }
 0x167   : > { %v1294_v63 = vmul.f32 %v2989_v12, %v960_v14  ;;  %v1596_v50 = vmul.f32 %v4190_v16, %v961_v5  ;;  %v1627_v46 = vadd.f32 %v1595_v56, %v3427_v29  ;;  %v1695_v3 = vmul.f32 %v3002_v23, %v1060_v45 }
 0x168   : > { %v1907_v40 = vadd.f32 3.0, %v1875_v54  ;;  %v1908_v7 = vadd.f32 3.0, %v1876_v31  ;;  %v1295_v53 = vmul.f32 %v2989_v12, %v961_v5  ;;  %v1795_v26 = vmul.f32 %v3005_v25, %v1160_v37 }
 0x169   : > { %v1628_v11 = vadd.f32 %v1596_v50, %v3439_v18  ;;  %v2095_v33 = vsel %vm338_vm0, %v3458_v62, 0.0  ;;  %v1727_v14 = vadd.f32 %v1695_v3, %v1627_v46  ;;  %v1196_v16 = vmul.f32 %v2938_v61, %v1160_v37 }
 0x16a   : > { %v1939_v51 = vmax.f32 %v1907_v40, 0.0  ;;  %v1940_v21 = vmax.f32 %v1908_v7, 0.0  ;;  %v3526_v48 = vadd.f32 %v2095_v33, %v2094_v49  ;;  %v896_v29 = vmul.f32 %v3444_v19, %v3272_v24 }
 0x16b   : > { %v1728_v22 = vadd.f32 %v1696_v52, %v1628_v11  ;;  %v895_v5 = vmul.f32 %v863_v55, %v3279_v43  ;;  %v1394_v50 = vmul.f32 %v2983_v8, %v1060_v45  ;;  %v1827_v25 = vadd.f32 %v1795_v26, %v1727_v14 }
 0x16c   : > { %v1971_v56 = vmin.f32 %v1939_v51, 6.0  ;;  %v1972_v18 = vmin.f32 %v1940_v21, 6.0  ;;  %v1326_v62 = vadd.f32 %v1294_v63, %v3425_v0  ;;  %931 = vst.msk [vmem:[#allocation2 + $0x190] sm:$0xff] %vm338_vm0, %v896_v29  ;;  %v854_v33 = vmul.f32 0.16666667, %v822_v59 }
 0x16d   : > { %v1828_v40 = vadd.f32 %v1796_v1, %v1728_v22  ;;  %930 = vst.msk [vmem:[#allocation2 + $0x188] sm:$0xff] %vm338_vm0, %v895_v5  ;;  %v821_v49 = vmin.f32 %v789_v32, 6.0  ;;  %v1327_v24 = vadd.f32 %v1295_v53, %v3434_v9  ;;  %v1865_v43 = vadd.f32 %v3079_v6, %v1827_v25 }
 0x16e   : > { %v2003_v52 = vmul.f32 0.16666667, %v1971_v56  ;;  %v2004_v7 = vmul.f32 0.16666667, %v1972_v18  ;;  %v886_v51 = vmul.f32 %v854_v33, %v3409_v10  ;;  %v4214_v19 = vmax.f32 %v3442_v30, 0.0 }
 0x16f   : > { %v1866_v21 = vadd.f32 %v3079_v6, %v1828_v40  ;;  %v853_v0 = vmul.f32 0.16666667, %v821_v49  ;;  %v1128_v32 = vadd.f32 %v1096_v58, %v996_v35  ;;  %v1897_v22 = vadd.f32 3.0, %v1865_v43 }
 0x170   : > { %v834_v55 = vmin.f32 %v4214_v19, 6.0  ;;  %v3542_v26 = vmul.f32 %v2003_v52, %v1875_v54  ;;  %v3544_v59 = vmul.f32 %v2004_v7, %v1876_v31  ;;  %v1426_v45 = vadd.f32 %v1394_v50, %v1326_v62  ;;  %921 = vst.msk [vmem:[#allocation2 + $0xf0] sm:$0xff] %vm338_vm0, %v886_v51  ;;  %v4217_v50 = vld [vmem:[#allocation22_spill] sm:$0xff] }
 0x171   : > { %v1898_v1 = vadd.f32 3.0, %v1866_v21  ;;  %v885_v25 = vmul.f32 %v853_v0, %v3415_v13  ;;  %v1129_v6 = vadd.f32 %v1097_v28, %v997_v15  ;;  %v1427_v10 = vadd.f32 %v1395_v2, %v1327_v24  ;;  %v4218_v0 = vld [vmem:[#allocation20_spill] sm:$0xff] }
 0x172   : > { %4215 = vst [vmem:[#allocation15_spill] sm:$0xff] %v3542_v26  ;;  %4216 = vst [vmem:[#allocation16_spill] sm:$0xff] %v3544_v59  ;;  %v866_v9 = vmul.f32 0.16666667, %v834_v55  ;;  %v1494_v30 = vmul.f32 %v2986_v4, %v1160_v37  ;;  %v1929_v54 = vmax.f32 %v1897_v22, 0.0  ;;  %v769_v58 = vadd.f32 3.0, %v3453_v34 }
 0x173   : > { %2068 = vst.msk [vmem:[%s3125_s16 + $0x90] sm:$0xff] %vm338_vm0, %v3542_v26  ;;  %2069 = vst.msk [vmem:[%s3125_s16 + $0x98] sm:$0xff] %vm338_vm0, %v3544_v59  ;;  %v1930_v31 = vmax.f32 %v1898_v1, 0.0  ;;  %v3559_v13 = vadd.f32 3.0, %v3490_v27  ;;  %v1536_v63 = vadd.f32 %v3500_v36, %v3502_v47  ;;  %v1197_v28 = vmul.f32 %v2938_v61, %v3486_v20  ;;  %v1073_v47 = vld [vmem:[#allocation2 + $0x190] sm:$0xff] }
 0x174   : > { %920 = vst.msk [vmem:[#allocation2 + $0xe8] sm:$0xff] %vm338_vm0, %v885_v25  ;;  %v898_v35 = vmul.f32 %v866_v9, %v3420_v44  ;;  %v1495_v2 = vmul.f32 %v2986_v4, %v3486_v20  ;;  %v1961_v37 = vmin.f32 %v1929_v54, 6.0  ;;  %v3567_v15 = vadd.f32 %v1196_v16, %v1128_v32  ;;  %v972_v3 = vld [vmem:[#allocation2 + $0x187] sm:$0xff]  ;;  %v973_v14 = vld [vmem:[#allocation2 + $0x18f] sm:$0xff] }
 0x175   : > { %v3569_v46 = vadd.f32 %v1494_v30, %v1426_v45  ;;  %v1962_v44 = vmin.f32 %v1930_v31, 6.0  ;;  %v1072_v53 = vld [vmem:[#allocation2 + $0x188] sm:$0xff]  ;;  %v1239_v11 = vadd.f32 %v3484_v60, %v3495_v39  ;;  %v1537_v29 = vadd.f32 %v3493_v17, %v3504_v38 }
 0x176   : > { %933 = vst.msk [vmem:[#allocation2 + $0x1b0] sm:$0xff] %vm338_vm0, %v898_v35  ;;  %v1993_v36 = vmul.f32 0.16666667, %v1961_v37  ;;  %v3576_v20 = vadd.f32 %v1197_v28, %v1129_v6  ;;  %v3578_v16 = vadd.f32 %v1495_v2, %v1427_v10  ;;  %v801_v56 = vmax.f32 %v769_v58, 0.0  ;;  %v1172_v52 = vld [vmem:[#allocation2 + $0x189] sm:$0xff] }
 0x177   : > { %v1994_v5 = vmul.f32 0.16666667, %v1962_v44  ;;  %v3583_v60 = vadd.f32 %v3449_v57, %v4217_v50  ;;  %v1008_v62 = vmul.f32 %v2927_v42, %v972_v3  ;;  %v1108_v40 = vmul.f32 %v2924_v41, %v1072_v53  ;;  %v4219_v32 = vld [vmem:[#allocation17_spill] sm:$0xff]  ;;  %v4220_v45 = vld [vmem:[#allocation18_spill] sm:$0xff]  ;;  %v4221_v44 = vld [vmem:[#allocation23_spill] sm:$0xff] }
 0x178   : > { %v2025_v39 = vmul.f32 %v1993_v36, %v1865_v43  ;;  %v1306_v17 = vmul.f32 %v2989_v12, %v972_v3  ;;  %v1109_v33 = vmul.f32 %v2924_v41, %v1073_v47  ;;  %v1407_v49 = vmul.f32 %v2983_v8, %v1073_v47  ;;  %v1173_v43 = vld [vmem:[#allocation2 + $0x191] sm:$0xff] }
 0x179   : > { %v3588_v38 = vmul.f32 %v1994_v5, %v1866_v21  ;;  %v1307_v7 = vmul.f32 %v2989_v12, %v973_v14  ;;  %v1708_v51 = vmul.f32 %v3002_v23, %v1073_v47  ;;  %v1406_v55 = vmul.f32 %v2983_v8, %v1072_v53  ;;  %v1063_v2 = vld [vmem:[#allocation2 + $0xf0] sm:$0xff] }
 0x17a   : > { %2058 = vst.msk [vmem:[%s3125_s16 + $0x40] sm:$0xff] %vm338_vm0, %v2025_v39  ;;  %v2097_v24 = vsel %vm338_vm0, %v2025_v39, 0.0  ;;  %v1338_v19 = vadd.f32 %v1306_v17, %v4218_v0  ;;  %v1808_v22 = vmul.f32 %v4219_v32, %v1173_v43  ;;  %v1607_v1 = vmul.f32 %v4220_v45, %v972_v3 }
 0x17b   : > { %2059 = vst.msk [vmem:[%s3125_s16 + $0x48] sm:$0xff] %vm338_vm0, %v3588_v38  ;;  %v2098_v21 = vadd.f32 %v2097_v24, %v3526_v48  ;;  %v1608_v25 = vmul.f32 %v4220_v45, %v973_v14  ;;  %v1009_v9 = vmul.f32 %v2927_v42, %v973_v14  ;;  %v1140_v6 = vadd.f32 %v1108_v40, %v1008_v62  ;;  %v1163_v14 = vld [vmem:[#allocation2 + $0xf1] sm:$0xff]  ;;  %v962_v39 = vld [vmem:[#allocation2 + $0xe7] sm:$0xff] }
 0x17c   : > { %v1208_v10 = vmul.f32 %v2938_v61, %v1172_v52  ;;  %v1707_v30 = vmul.f32 %v3002_v23, %v1072_v53  ;;  %v1339_v54 = vadd.f32 %v1307_v7, %v1239_v11  ;;  %v1639_v31 = vadd.f32 %v1607_v1, %v1536_v63  ;;  %v4222_v53 = vld [vmem:[#allocation25_spill] sm:$0xff]  ;;  %v963_v7 = vld [vmem:[#allocation2 + $0xef] sm:$0xff] }
 0x17d   : > { %v1640_v35 = vadd.f32 %v1608_v25, %v1537_v29  ;;  %v1807_v58 = vmul.f32 %v4219_v32, %v1172_v52  ;;  %v1438_v28 = vadd.f32 %v1406_v55, %v1338_v19  ;;  %v1506_v48 = vmul.f32 %v2986_v4, %v1172_v52  ;;  %v1062_v24 = vld [vmem:[#allocation2 + $0xe8] sm:$0xff] }
 0x17e   : > { %v833_v37 = vmin.f32 %v801_v56, 6.0  ;;  %v3613_v3 = vadd.f32 %v3449_v57, %v4221_v44  ;;  %v1739_v36 = vadd.f32 %v1707_v30, %v1639_v31  ;;  %v3616_v5 = vadd.f32 3.0, %v3583_v60  ;;  %v1162_v1 = vld [vmem:[#allocation2 + $0xe9] sm:$0xff] }
 0x17f   : > { %v1740_v47 = vadd.f32 %v1708_v51, %v1640_v35  ;;  %v3620_v63 = vadd.f32 %v3449_v57, %v4222_v53  ;;  %v3623_v11 = vmul.f32 %v2938_v61, %v1173_v43  ;;  %v3626_v29 = vmul.f32 %v2986_v4, %v1173_v43 }
 0x180   : > { %v3628_v56 = vadd.f32 %v1109_v33, %v1009_v9  ;;  %v3630_v50 = vadd.f32 %v1208_v10, %v1140_v6  ;;  %v3632_v62 = vadd.f32 %v1407_v49, %v1339_v54  ;;  %v1839_v40 = vadd.f32 %v1807_v58, %v1739_v36  ;;  %v3649_v49 = vld [vmem:[%s4137_s4] ss:$0 sm:$0xff] }
 0x181   : > { %v1840_v17 = vadd.f32 %v1808_v22, %v1740_v47  ;;  %v1099_v52 = vmul.f32 %v2924_v41, %v1063_v2  ;;  %v3635_v51 = vadd.f32 %v1506_v48, %v1438_v28  ;;  %v3638_v0 = vmul.f32 %v2938_v61, %v1163_v14 }
 0x182   : > { %v3641_v43 = vmul.f32 %v2983_v8, %v1063_v2  ;;  %v3644_v33 = vmul.f32 %v2986_v4, %v1163_v14  ;;  %v1877_v19 = vadd.f32 %v3649_v49, %v1839_v40  ;;  %v1698_v22 = vmul.f32 %v3002_v23, %v1063_v2 }
 0x183   : > { %v1878_v55 = vadd.f32 %v3649_v49, %v1840_v17  ;;  %v1597_v25 = vmul.f32 %v4220_v45, %v962_v39  ;;  %v998_v9 = vmul.f32 %v2927_v42, %v962_v39  ;;  %v999_v6 = vmul.f32 %v2927_v42, %v963_v7 }
 0x184   : > { %v1098_v10 = vmul.f32 %v2924_v41, %v1062_v24  ;;  %v1598_v30 = vmul.f32 %v4220_v45, %v963_v7  ;;  %v1909_v54 = vadd.f32 3.0, %v1877_v19  ;;  %v1697_v58 = vmul.f32 %v3002_v23, %v1062_v24 }
 0x185   : > { %v1910_v31 = vadd.f32 3.0, %v1878_v55  ;;  %v1629_v35 = vadd.f32 %v1597_v25, %v3569_v46  ;;  %v1296_v28 = vmul.f32 %v2989_v12, %v962_v39  ;;  %v1797_v2 = vmul.f32 %v4219_v32, %v1162_v1 }
 0x186   : > { %v1630_v48 = vadd.f32 %v1598_v30, %v3578_v16  ;;  %v2099_v44 = vsel %vm338_vm0, %v3588_v38, 0.0  ;;  %v1941_v36 = vmax.f32 %v1909_v54, 0.0  ;;  %v1798_v17 = vmul.f32 %v4219_v32, %v1163_v14 }
 0x187   : > { %v1942_v47 = vmax.f32 %v1910_v31, 0.0  ;;  %v1729_v53 = vadd.f32 %v1697_v58, %v1629_v35  ;;  %v3666_v40 = vadd.f32 %v2099_v44, %v2098_v21  ;;  %v1198_v46 = vmul.f32 %v2938_v61, %v1162_v1  ;;  %v4226_v44 = vld [vmem:[#allocation30_spill] sm:$0xff] }
 0x188   : > { %v1297_v25 = vmul.f32 %v2989_v12, %v963_v7  ;;  %v1730_v18 = vadd.f32 %v1698_v22, %v1630_v48  ;;  %v1973_v39 = vmin.f32 %v1941_v36, 6.0  ;;  %v1396_v16 = vmul.f32 %v2983_v8, %v1062_v24 }
 0x189   : > { %v1974_v59 = vmin.f32 %v1942_v47, 6.0  ;;  %v1829_v30 = vadd.f32 %v1797_v2, %v1729_v53  ;;  %v1130_v26 = vadd.f32 %v1098_v10, %v998_v9  ;;  %v1328_v38 = vadd.f32 %v1296_v28, %v3567_v15  ;;  %v4227_v47 = vld [vmem:[#allocation31_spill] sm:$0xff] }
 0x18a   : > { %v1830_v54 = vadd.f32 %v1798_v17, %v1730_v18  ;;  %v865_v31 = vmul.f32 0.16666667, %v833_v37  ;;  %v2005_v35 = vmul.f32 0.16666667, %v1973_v39  ;;  %v1131_v58 = vadd.f32 %v1099_v52, %v999_v6 }
 0x18b   : > { %v2006_v21 = vmul.f32 0.16666667, %v1974_v59  ;;  %v1867_v14 = vadd.f32 %v3649_v49, %v1829_v30  ;;  %v1496_v7 = vmul.f32 %v2986_v4, %v1162_v1  ;;  %v4223_v24 = vmax.f32 %v3559_v13, 0.0  ;;  %v1075_v13 = vld [vmem:[#allocation2 + $0x1b0] sm:$0xff] }
 0x18c   : > { %v1868_v22 = vadd.f32 %v3649_v49, %v1830_v54  ;;  %v897_v48 = vmul.f32 %v865_v31, %v3453_v34  ;;  %v3679_v10 = vmul.f32 %v2005_v35, %v1877_v19  ;;  %v791_v59 = vmax.f32 %v3616_v5, 0.0 }
 0x18d   : > { %v824_v9 = vmin.f32 %v4223_v24, 6.0  ;;  %v3681_v15 = vmul.f32 %v2006_v21, %v1878_v55  ;;  %v1899_v18 = vadd.f32 3.0, %v1867_v14  ;;  %v1329_v37 = vadd.f32 %v1297_v25, %v3576_v20  ;;  %v1175_v20 = vld [vmem:[#allocation2 + $0x1b1] sm:$0xff] }
 0x18e   : > { %4224 = vst [vmem:[#allocation21_spill] sm:$0xff] %v3679_v10  ;;  %v1428_v52 = vadd.f32 %v1396_v16, %v1328_v38  ;;  %v1900_v6 = vadd.f32 3.0, %v1868_v22  ;;  %932 = vst.msk [vmem:[#allocation2 + $0x1a8] sm:$0xff] %vm338_vm0, %v897_v48  ;;  %v823_v19 = vmin.f32 %v791_v59, 6.0  ;;  %v772_v55 = vadd.f32 3.0, %v3613_v3 }
 0x18f   : > { %4225 = vst [vmem:[#allocation22_spill] sm:$0xff] %v3681_v15  ;;  %v856_v1 = vmul.f32 0.16666667, %v824_v9  ;;  %2070 = vst.msk [vmem:[%s3125_s16 + $0xa0] sm:$0xff] %vm338_vm0, %v3679_v10  ;;  %v1931_v34 = vmax.f32 %v1899_v18, 0.0  ;;  %v771_v5 = vadd.f32 3.0, %v3620_v63  ;;  %v3697_v36 = vadd.f32 %v3449_v57, %v4226_v44 }
 0x190   : > { %2071 = vst.msk [vmem:[%s3125_s16 + $0xa8] sm:$0xff] %vm338_vm0, %v3681_v15  ;;  %v1932_v28 = vmax.f32 %v1900_v6, 0.0  ;;  %v3701_v53 = vadd.f32 %v3449_v57, %v4227_v47  ;;  %v3703_v17 = vadd.f32 %v1198_v46, %v1130_v26  ;;  %v855_v39 = vmul.f32 0.16666667, %v823_v19 }
 0x191   : > { %v888_v2 = vmul.f32 %v856_v1, %v3490_v27  ;;  %v1963_v25 = vmin.f32 %v1931_v34, 6.0  ;;  %v804_v16 = vmax.f32 %v772_v55, 0.0  ;;  %v1429_v30 = vadd.f32 %v3641_v43, %v1329_v37 }
 0x192   : > { %4228 = vst [vmem:[#allocation20_spill] sm:$0xff] %v3701_v53  ;;  %v3706_v38 = vadd.f32 %v1496_v7, %v1428_v52  ;;  %v1964_v54 = vmin.f32 %v1932_v28, 6.0  ;;  %v3709_v27 = vmul.f32 %v2924_v41, %v1075_v13  ;;  %v3713_v35 = vmul.f32 %v2938_v61, %v1175_v20 }
 0x193   : > { %923 = vst.msk [vmem:[#allocation2 + $0x110] sm:$0xff] %vm338_vm0, %v888_v2  ;;  %v1995_v31 = vmul.f32 0.16666667, %v1963_v25  ;;  %v887_v26 = vmul.f32 %v855_v39, %v3583_v60  ;;  %v803_v46 = vmax.f32 %v771_v5, 0.0  ;;  %v836_v48 = vmin.f32 %v804_v16, 6.0  ;;  %v4230_v5 = vld [vmem:[#allocation24_spill] sm:$0xff] }
 0x194   : > { %4229 = vst [vmem:[#allocation17_spill] sm:$0xff] %v3713_v35  ;;  %v1996_v21 = vmul.f32 0.16666667, %v1964_v54  ;;  %v3717_v43 = vadd.f32 3.0, %v3697_v36  ;;  %v3720_v7 = vadd.f32 3.0, %v3701_v53  ;;  %v3723_v9 = vmul.f32 %v2983_v8, %v1075_v13 }
 0x195   : > { %v2027_v24 = vmul.f32 %v1995_v31, %v1867_v14  ;;  %v3726_v18 = vmul.f32 %v2986_v4, %v1175_v20  ;;  %v1710_v60 = vmul.f32 %v3002_v23, %v1075_v13  ;;  %922 = vst.msk [vmem:[#allocation2 + $0x108] sm:$0xff] %vm338_vm0, %v887_v26  ;;  %v1810_v37 = vmul.f32 %v4219_v32, %v1175_v20  ;;  %v974_v52 = vld [vmem:[#allocation2 + $0x1a7] sm:$0xff]  ;;  %v975_v6 = vld [vmem:[#allocation2 + $0x1af] sm:$0xff] }
 0x196   : > { %v3730_v59 = vmul.f32 %v1996_v21, %v1868_v22  ;;  %v3733_v1 = vld [vmem:[#allocation2 + $0x1a8] sm:$0xff]  ;;  %v3737_v14 = vadd.f32 %v3623_v11, %v3628_v56  ;;  %v1539_v34 = vadd.f32 %v3626_v29, %v3632_v62  ;;  %v1231_v22 = vadd.f32 %v3638_v0, %v1131_v58 }
 0x197   : > { %2060 = vst.msk [vmem:[%s3125_s16 + $0x50] sm:$0xff] %vm338_vm0, %v2027_v24  ;;  %v3743_v13 = vld [vmem:[#allocation2 + $0x1a9] sm:$0xff]  ;;  %v3747_v19 = vadd.f32 %v3644_v33, %v1429_v30  ;;  %v3749_v55 = vmin.f32 %v803_v46, 6.0  ;;  %v3753_v28 = vadd.f32 %v3449_v57, %v4230_v5  ;;  %v2101_v11 = vsel %vm338_vm0, %v2027_v24, 0.0 }
 0x198   : > { %2061 = vst.msk [vmem:[%s3125_s16 + $0x58] sm:$0xff] %vm338_vm0, %v3730_v59  ;;  %v3759_v29 = vmul.f32 0.16666667, %v836_v48  ;;  %v3764_v0 = vmul.f32 %v2927_v42, %v974_v52  ;;  %v3767_v33 = vmul.f32 %v2927_v42, %v975_v6  ;;  %v3771_v58 = vmul.f32 %v2924_v41, %v3733_v1 }
 0x199   : > { %4231 = vst [vmem:[#allocation18_spill] sm:$0xff] %v3753_v28  ;;  %v1609_v20 = vmul.f32 %v4220_v45, %v974_v52  ;;  %v3776_v47 = vmul.f32 %v2938_v61, %v3743_v13  ;;  %v3779_v25 = vmul.f32 %v2989_v12, %v974_v52  ;;  %v1610_v39 = vmul.f32 %v4220_v45, %v975_v6 }
 0x19a   : > { %v1065_v2 = vld [vmem:[#allocation2 + $0x110] sm:$0xff]  ;;  %v1709_v16 = vmul.f32 %v3002_v23, %v3733_v1  ;;  %v3785_v30 = vadd.f32 %v2101_v11, %v3666_v40  ;;  %v3788_v54 = vmul.f32 %v2989_v12, %v975_v6  ;;  %v1809_v26 = vmul.f32 %v4219_v32, %v3743_v13 }
 0x19b   : > { %v1165_v44 = vld [vmem:[#allocation2 + $0x111] sm:$0xff]  ;;  %4232 = vst [vmem:[#allocation23_spill] sm:$0xff] %v3776_v47  ;;  %v1641_v31 = vadd.f32 %v1609_v20, %v3635_v51  ;;  %v1642_v46 = vadd.f32 %v1610_v39, %v1539_v34  ;;  %v1101_v21 = vmul.f32 %v2924_v41, %v1065_v2  ;;  %v1399_v24 = vmul.f32 %v2983_v8, %v1065_v2 }
 0x19c   : > { %v1201_v48 = vmul.f32 %v2938_v61, %v1165_v44  ;;  %v964_v52 = vld [vmem:[#allocation2 + $0x107] sm:$0xff]  ;;  %v965_v5 = vld [vmem:[#allocation2 + $0x10f] sm:$0xff]  ;;  %v1499_v11 = vmul.f32 %v2986_v4, %v1165_v44  ;;  %v1700_v6 = vmul.f32 %v3002_v23, %v1065_v2  ;;  %v1800_v51 = vmul.f32 %v4219_v32, %v1165_v44 }
 0x19d   : > { %v1064_v62 = vld [vmem:[#allocation2 + $0x108] sm:$0xff]  ;;  %v1741_v40 = vadd.f32 %v1709_v16, %v1641_v31  ;;  %v1742_v56 = vadd.f32 %v1710_v60, %v1642_v46  ;;  %v1000_v34 = vmul.f32 %v2927_v42, %v964_v52  ;;  %v1001_v39 = vmul.f32 %v2927_v42, %v965_v5 }
 0x19e   : > { %v1164_v20 = vld [vmem:[#allocation2 + $0x109] sm:$0xff]  ;;  %v1100_v15 = vmul.f32 %v2924_v41, %v1064_v62  ;;  %v1298_v35 = vmul.f32 %v2989_v12, %v964_v52  ;;  %v1299_v16 = vmul.f32 %v2989_v12, %v965_v5  ;;  %v1398_v44 = vmul.f32 %v2983_v8, %v1064_v62 }
 0x19f   : > { %v1841_v10 = vadd.f32 %v1809_v26, %v1741_v40  ;;  %v1200_v53 = vmul.f32 %v2938_v61, %v1164_v20  ;;  %v1842_v31 = vadd.f32 %v1810_v37, %v1742_v56  ;;  %v1133_v2 = vadd.f32 %v1101_v21, %v1001_v39  ;;  %v4233_v21 = vld [vmem:[#allocation32_spill] sm:$0xff] }
 0x1a0   : > { %v1132_v47 = vadd.f32 %v1100_v15, %v1000_v34  ;;  %v1330_v46 = vadd.f32 %v1298_v35, %v3703_v17  ;;  %v1331_v57 = vadd.f32 %v1299_v16, %v1231_v22  ;;  %v1498_v42 = vmul.f32 %v2986_v4, %v1164_v20 }
 0x1a1   : > { %v1879_v60 = vadd.f32 %v3649_v49, %v1841_v10  ;;  %v1880_v26 = vadd.f32 %v3649_v49, %v1842_v31  ;;  %v1233_v61 = vadd.f32 %v1201_v48, %v1133_v2  ;;  %v1599_v41 = vmul.f32 %v4220_v45, %v964_v52  ;;  %v4234_v10 = vld [vmem:[#allocation33_spill] sm:$0xff]  ;;  %v4235_v48 = vld [vmem:[#allocation34_spill] sm:$0xff] }
 0x1a2   : > { %v1232_v40 = vadd.f32 %v1200_v53, %v1132_v47  ;;  %v1430_v12 = vadd.f32 %v1398_v44, %v1330_v46  ;;  %v1431_v37 = vadd.f32 %v1399_v24, %v1331_v57  ;;  %v1600_v15 = vmul.f32 %v4220_v45, %v965_v5  ;;  %v4236_v31 = vld [vmem:[#allocation26_spill] sm:$0xff]  ;;  %v4237_v5 = vld [vmem:[#allocation36_spill] sm:$0xff]  ;;  %v4238_v46 = vld [vmem:[#allocation37_spill] sm:$0xff] }
 0x1a3   : > { %v1911_v28 = vadd.f32 3.0, %v1879_v60  ;;  %v1912_v56 = vadd.f32 3.0, %v1880_v26  ;;  %v1333_v39 = vadd.f32 %v4234_v10, %v1233_v61  ;;  %v1631_v17 = vadd.f32 %v1599_v41, %v3706_v38  ;;  %v4239_v41 = vld [vmem:[#allocation35_spill] sm:$0xff]  ;;  %v4243_v10 = vld [vmem:[#allocation40_spill] sm:$0xff] }
 0x1a4   : > { %v1332_v34 = vadd.f32 %v4233_v21, %v1232_v40  ;;  %v1530_v22 = vadd.f32 %v1498_v42, %v1430_v12  ;;  %v1531_v16 = vadd.f32 %v1499_v11, %v1431_v37  ;;  %v1632_v53 = vadd.f32 %v1600_v15, %v3747_v19  ;;  %v4240_v42 = vld [vmem:[#allocation27_spill] sm:$0xff]  ;;  %v4241_v11 = vld [vmem:[#allocation38_spill] sm:$0xff]  ;;  %v4242_v15 = vld [vmem:[#allocation28_spill] sm:$0xff] }
 0x1a5   : > { %v1943_v35 = vmax.f32 %v1911_v28, 0.0  ;;  %v1944_v47 = vmax.f32 %v1912_v56, 0.0  ;;  %v1433_v2 = vadd.f32 %v4236_v31, %v1333_v39  ;;  %v1699_v57 = vmul.f32 %v3002_v23, %v1064_v62 }
 0x1a6   : > { %v1432_v52 = vadd.f32 %v4235_v48, %v1332_v34  ;;  %v1633_v44 = vadd.f32 %v4237_v5, %v1530_v22  ;;  %v1634_v40 = vadd.f32 %v4238_v46, %v1531_v16  ;;  %v1732_v61 = vadd.f32 %v1700_v6, %v1632_v53  ;;  %v4246_v48 = vld [vmem:[#allocation29_spill] sm:$0xff] }
 0x1a7   : > { %v1975_v24 = vmin.f32 %v1943_v35, 6.0  ;;  %v1976_v21 = vmin.f32 %v1944_v47, 6.0  ;;  %v1533_v12 = vadd.f32 %v4240_v42, %v1433_v2  ;;  %v1731_v28 = vadd.f32 %v1699_v57, %v1631_v17  ;;  %v4244_v35 = vld [vmem:[#allocation41_spill] sm:$0xff]  ;;  %v4245_v47 = vld [vmem:[#allocation39_spill] sm:$0xff]  ;;  %v4247_v2 = vld [vmem:[#allocation42_spill] sm:$0xff] }
 0x1a8   : > { %v1532_v38 = vadd.f32 %v4239_v41, %v1432_v52  ;;  %v1733_v37 = vadd.f32 %v4241_v11, %v1633_v44  ;;  %v1734_v56 = vadd.f32 %v4242_v15, %v1634_v40  ;;  %v1799_v62 = vmul.f32 %v4219_v32, %v1164_v20  ;;  %v4249_v40 = vld [vmem:[#allocation43_spill] sm:$0xff] }
 0x1a9   : > { %v2007_v19 = vmul.f32 0.16666667, %v1975_v24  ;;  %v2008_v34 = vmul.f32 0.16666667, %v1976_v21  ;;  %v1636_v22 = vadd.f32 %v4244_v35, %v1533_v12  ;;  %v1832_v6 = vadd.f32 %v1800_v51, %v1732_v61  ;;  %v4248_v24 = vld [vmem:[#allocation12_spill] sm:$0xff]  ;;  %v4250_v21 = vld [vmem:[#allocation13_spill] sm:$0xff] }
 0x1aa   : > { %v1635_v39 = vadd.f32 %v4243_v10, %v1532_v38  ;;  %v1831_v53 = vadd.f32 %v1799_v62, %v1731_v28  ;;  %v1833_v17 = vadd.f32 %v4245_v47, %v1733_v37  ;;  %v1834_v52 = vadd.f32 %v4246_v48, %v1734_v56 }
 0x1ab   : > { %v3828_v16 = vmul.f32 %v2007_v19, %v1879_v60  ;;  %v3832_v31 = vmul.f32 %v2008_v34, %v1880_v26  ;;  %v1736_v20 = vadd.f32 %v4248_v24, %v1636_v22  ;;  %v1870_v5 = vadd.f32 %v3649_v49, %v1832_v6 }
 0x1ac   : > { %v1735_v57 = vadd.f32 %v4247_v2, %v1635_v39  ;;  %v1408_v44 = vmul.f32 %v2983_v8, %v3733_v1  ;;  %v1869_v51 = vadd.f32 %v3649_v49, %v1831_v53  ;;  %v1871_v60 = vadd.f32 %v3649_v49, %v1833_v17 }
 0x1ad   : > { %2072 = vst.msk [vmem:[%s3125_s16 + $0xb0] sm:$0xff] %vm338_vm0, %v3828_v16  ;;  %v1872_v46 = vadd.f32 %v3649_v49, %v1834_v52  ;;  %v1340_v26 = vadd.f32 %v3779_v25, %v3630_v50  ;;  %2073 = vst.msk [vmem:[%s3125_s16 + $0xb8] sm:$0xff] %vm338_vm0, %v3832_v31  ;;  %v1836_v41 = vadd.f32 %v4250_v21, %v1736_v20  ;;  %v1902_v1 = vadd.f32 3.0, %v1870_v5 }
 0x1ae   : > { %v1835_v61 = vadd.f32 %v4249_v40, %v1735_v57  ;;  %v1901_v38 = vadd.f32 3.0, %v1869_v51  ;;  %v1903_v42 = vadd.f32 3.0, %v1871_v60  ;;  %v900_v28 = vmul.f32 %v3759_v29, %v3613_v3 }
 0x1af   : > { %v1904_v12 = vadd.f32 3.0, %v1872_v46  ;;  %v1874_v11 = vadd.f32 %v3649_v49, %v1836_v41  ;;  %v1934_v37 = vmax.f32 %v1902_v1, 0.0  ;;  %v867_v50 = vmul.f32 0.16666667, %v3749_v55 }
 0x1b0   : > { %v1873_v19 = vadd.f32 %v3649_v49, %v1835_v61  ;;  %v1341_v25 = vadd.f32 %v3788_v54, %v3737_v14  ;;  %v1933_v15 = vmax.f32 %v1901_v38, 0.0  ;;  %v1935_v56 = vmax.f32 %v1903_v42, 0.0  ;;  %935 = vst.msk [vmem:[#allocation2 + $0x1d0] sm:$0xff] %vm338_vm0, %v900_v28  ;;  %v4253_v28 = vld [vmem:[#allocation18_spill] sm:$0xff] }
 0x1b1   : > { %v1936_v62 = vmax.f32 %v1904_v12, 0.0  ;;  %v1906_v10 = vadd.f32 3.0, %v1874_v11  ;;  %v1966_v39 = vmin.f32 %v1934_v37, 6.0  ;;  %v899_v3 = vmul.f32 %v867_v50, %v3620_v63  ;;  %v4255_v37 = vld [vmem:[#allocation19_spill] sm:$0xff] }
 0x1b2   : > { %v1905_v34 = vadd.f32 3.0, %v1873_v19  ;;  %v1965_v29 = vmin.f32 %v1933_v15, 6.0  ;;  %v1967_v35 = vmin.f32 %v1935_v56, 6.0  ;;  %v2103_v6 = vsel %vm338_vm0, %v3730_v59, 0.0 }
 0x1b3   : > { %v1968_v22 = vmin.f32 %v1936_v62, 6.0  ;;  %v1938_v53 = vmax.f32 %v1906_v10, 0.0  ;;  %v1998_v47 = vmul.f32 0.16666667, %v1966_v39  ;;  %934 = vst.msk [vmem:[#allocation2 + $0x1c8] sm:$0xff] %vm338_vm0, %v899_v3  ;;  %v4251_v14 = vmax.f32 %v3717_v43, 0.0 }
 0x1b4   : > { %v1937_v55 = vmax.f32 %v1905_v34, 0.0  ;;  %v1997_v17 = vmul.f32 0.16666667, %v1965_v29  ;;  %v1999_v48 = vmul.f32 0.16666667, %v1967_v35  ;;  %v2104_v63 = vadd.f32 %v2103_v6, %v3785_v30  ;;  %v4257_v39 = vld [vmem:[#allocation17_spill] sm:$0xff] }
 0x1b5   : > { %v838_v54 = vmin.f32 %v4251_v14, 6.0  ;;  %v2000_v52 = vmul.f32 0.16666667, %v1968_v22  ;;  %v1970_v57 = vmin.f32 %v1938_v53, 6.0  ;;  %v2030_v24 = vmul.f32 %v1998_v47, %v1870_v5  ;;  %v4258_v29 = vld [vmem:[#allocation14_spill] sm:$0xff] }
 0x1b6   : > { %v1969_v2 = vmin.f32 %v1937_v55, 6.0  ;;  %v1142_v20 = vadd.f32 %v3771_v58, %v3764_v0  ;;  %v2029_v40 = vmul.f32 %v1997_v17, %v1869_v51  ;;  %v2031_v61 = vmul.f32 %v1999_v48, %v1871_v60  ;;  %v4259_v53 = vld [vmem:[#allocation10_spill] sm:$0xff]  ;;  %v4260_v48 = vld [vmem:[#allocation20_spill] sm:$0xff] }
 0x1b7   : > { %v870_v59 = vmul.f32 0.16666667, %v838_v54  ;;  %v3869_v43 = vmul.f32 %v2000_v52, %v1872_v46  ;;  %v2002_v41 = vmul.f32 0.16666667, %v1970_v57  ;;  %2063 = vst.msk [vmem:[%s3125_s16 + $0x68] sm:$0xff] %vm338_vm0, %v2030_v24  ;;  %v4252_v1 = vmax.f32 %v3720_v7, 0.0 }
 0x1b8   : > { %v2001_v21 = vmul.f32 0.16666667, %v1969_v2  ;;  %v1440_v5 = vadd.f32 %v1408_v44, %v1340_v26  ;;  %v1441_v42 = vadd.f32 %v3723_v9, %v1341_v25  ;;  %v1508_v0 = vmul.f32 %v2986_v4, %v3743_v13  ;;  %2062 = vst.msk [vmem:[%s3125_s16 + $0x60] sm:$0xff] %vm338_vm0, %v2029_v40  ;;  %2064 = vst.msk [vmem:[%s3125_s16 + $0x70] sm:$0xff] %vm338_vm0, %v2031_v61  ;;  %v4256_v25 = vld [vmem:[#allocation23_spill] sm:$0xff] }
 0x1b9   : > { %v902_v30 = vmul.f32 %v870_v59, %v3697_v36  ;;  %v837_v38 = vmin.f32 %v4252_v1, 6.0  ;;  %2065 = vst.msk [vmem:[%s3125_s16 + $0x78] sm:$0xff] %vm338_vm0, %v3869_v43  ;;  %v2105_v36 = vsel %vm338_vm0, %v2029_v40, 0.0  ;;  %v1143_v7 = vadd.f32 %v3709_v27, %v3767_v33  ;;  %v1077_v62 = vld [vmem:[#allocation2 + $0x1d0] sm:$0xff] }
 0x1ba   : > { %v3889_v58 = vmul.f32 %v2001_v21, %v1873_v19  ;;  %v3891_v44 = vmul.f32 %v2002_v41, %v1874_v11  ;;  %v2106_v9 = vadd.f32 %v2105_v36, %v2104_v63  ;;  %v2107_v13 = vsel %vm338_vm0, %v2030_v24, 0.0  ;;  %v976_v60 = vld [vmem:[#allocation2 + $0x1c7] sm:$0xff]  ;;  %v977_v26 = vld [vmem:[#allocation2 + $0x1cf] sm:$0xff]  ;;  %v4254_v11 = vld [vmem:[#allocation44_spill] sm:$0xff] }
 0x1bb   : > { %937 = vst.msk [vmem:[#allocation2 + $0x1f0] sm:$0xff] %vm338_vm0, %v902_v30  ;;  %v2109_v51 = vsel %vm338_vm0, %v2031_v61, 0.0  ;;  %v869_v27 = vmul.f32 0.16666667, %v837_v38  ;;  %v1540_v33 = vadd.f32 %v1508_v0, %v1440_v5  ;;  %v1541_v12 = vadd.f32 %v3726_v18, %v1441_v42  ;;  %v1177_v34 = vld [vmem:[#allocation2 + $0x1d1] sm:$0xff]  ;;  %v1076_v10 = vld [vmem:[#allocation2 + $0x1c8] sm:$0xff] }
 0x1bc   : > { %2066 = vst.msk [vmem:[%s3125_s16 + $0x80] sm:$0xff] %vm338_vm0, %v3889_v58  ;;  %2067 = vst.msk [vmem:[%s3125_s16 + $0x88] sm:$0xff] %vm338_vm0, %v3891_v44  ;;  %v2108_v46 = vadd.f32 %v2107_v13, %v2106_v9  ;;  %v776_v19 = vadd.f32 3.0, %v4253_v28  ;;  %v3906_v50 = vadd.f32 %v4255_v37, %v4254_v11  ;;  %v1242_v15 = vadd.f32 %v4256_v25, %v1142_v20  ;;  %v1176_v14 = vld [vmem:[#allocation2 + $0x1c9] sm:$0xff]  ;;  %v4262_v20 = vld [vmem:[#allocation15_spill] sm:$0xff] }
 0x1bd   : > { %v1243_v3 = vadd.f32 %v4257_v39, %v1143_v7  ;;  %v1310_v35 = vmul.f32 %v4258_v29, %v976_v60  ;;  %v1712_v22 = vmul.f32 %v3002_v23, %v1077_v62  ;;  %v1812_v18 = vmul.f32 %v4219_v32, %v1177_v34  ;;  %v4261_v63 = vld [vmem:[#allocation9_spill] sm:$0xff]  ;;  %v4263_v42 = vld [vmem:[#allocation11_spill] sm:$0xff] }
 0x1be   : > { %v2110_v56 = vadd.f32 %v2109_v51, %v2108_v46  ;;  %v1611_v6 = vmul.f32 %v4220_v45, %v976_v60  ;;  %v1612_v55 = vmul.f32 %v4220_v45, %v977_v26  ;;  %v1012_v47 = vmul.f32 %v4259_v53, %v976_v60 }
 0x1bf   : > { %v1311_v54 = vmul.f32 %v4258_v29, %v977_v26  ;;  %v1711_v17 = vmul.f32 %v3002_v23, %v1076_v10  ;;  %v901_v52 = vmul.f32 %v869_v27, %v4260_v48  ;;  %v1112_v2 = vmul.f32 %v4261_v63, %v1076_v10 }
 0x1c0   : > { %v1643_v57 = vadd.f32 %v1611_v6, %v1540_v33  ;;  %v1644_v24 = vadd.f32 %v1612_v55, %v1541_v12  ;;  %v1811_v59 = vmul.f32 %v4219_v32, %v1176_v14  ;;  %v3923_v40 = vsel %vm338_vm0, %v4262_v20, 0.0 }
 0x1c1   : > { %v1342_v61 = vadd.f32 %v1310_v35, %v1242_v15  ;;  %v1410_v21 = vmul.f32 %v2983_v8, %v1076_v10  ;;  %936 = vst.msk [vmem:[#allocation2 + $0x1e8] sm:$0xff] %vm338_vm0, %v901_v52  ;;  %v1113_v41 = vmul.f32 %v4261_v63, %v1077_v62  ;;  %v1013_v30 = vmul.f32 %v4259_v53, %v977_v26 }
 0x1c2   : > { %v1743_v1 = vadd.f32 %v1711_v17, %v1643_v57  ;;  %v1744_v38 = vadd.f32 %v1712_v22, %v1644_v24  ;;  %v1411_v5 = vmul.f32 %v2983_v8, %v1077_v62  ;;  %v1212_v0 = vmul.f32 %v4263_v42, %v1176_v14  ;;  %v1079_v25 = vld [vmem:[#allocation2 + $0x1f0] sm:$0xff] }
 0x1c3   : > { %v1343_v36 = vadd.f32 %v1311_v54, %v1243_v3  ;;  %v808_v7 = vmax.f32 %v776_v19, 0.0  ;;  %v1144_v9 = vadd.f32 %v1112_v2, %v1012_v47  ;;  %v775_v60 = vadd.f32 3.0, %v3906_v50  ;;  %v1179_v22 = vld [vmem:[#allocation2 + $0x1f1] sm:$0xff] }
 0x1c4   : > { %v1843_v13 = vadd.f32 %v1811_v59, %v1743_v1  ;;  %v1844_v51 = vadd.f32 %v1812_v18, %v1744_v38  ;;  %v1213_v46 = vmul.f32 %v4263_v42, %v1177_v34  ;;  %v1511_v27 = vmul.f32 %v2986_v4, %v1177_v34 }
 0x1c5   : > { %v1442_v33 = vadd.f32 %v1410_v21, %v1342_v61  ;;  %v1510_v26 = vmul.f32 %v2986_v4, %v1176_v14  ;;  %v1145_v12 = vadd.f32 %v1113_v41, %v1013_v30  ;;  %v1443_v19 = vadd.f32 %v1411_v5, %v1343_v36 }
 0x1c6   : > { %v1881_v11 = vadd.f32 %v3649_v49, %v1843_v13  ;;  %v1882_v37 = vadd.f32 %v3649_v49, %v1844_v51  ;;  %v840_v15 = vmin.f32 %v808_v7, 6.0  ;;  %v807_v62 = vmax.f32 %v775_v60, 0.0 }
 0x1c7   : > { %v4264_v10 = vmov 0.0   ;;  %v2111_v34 = vsel %vm338_vm0, %v3869_v43, 0.0  ;;  %v1244_v39 = vadd.f32 %v1212_v0, %v1144_v9  ;;  %v1542_v55 = vadd.f32 %v1510_v26, %v1442_v33 }
 0x1c8   : > { %945 = vst.msk [vmem:[%s3938_s27] sm:$0x1] %vm944_vm2, %v4264_v10  ;;  %v1913_v3 = vadd.f32 3.0, %v1881_v11  ;;  %v1914_v35 = vadd.f32 3.0, %v1882_v37  ;;  %v978_v18 = vld [vmem:[#allocation2 + $0x1e7] sm:$0xff]  ;;  %v2112_v6 = vadd.f32 %v2111_v34, %v2110_v56  ;;  %v1115_v47 = vmul.f32 %v4261_v63, %v1079_v25  ;;  %v979_v52 = vld [vmem:[#allocation2 + $0x1ef] sm:$0xff] }
 0x1c9   : > { %v1714_v14 = vmul.f32 %v3002_v23, %v1079_v25  ;;  %v1814_v54 = vmul.f32 %v4219_v32, %v1179_v22  ;;  %v1078_v2 = vld [vmem:[#allocation2 + $0x1e8] sm:$0xff]  ;;  %v1245_v57 = vadd.f32 %v1213_v46, %v1145_v12  ;;  %v1312_v43 = vmul.f32 %v4258_v29, %v978_v18 }
 0x1ca   : > { %v1945_v17 = vmax.f32 %v1913_v3, 0.0  ;;  %v1946_v48 = vmax.f32 %v1914_v35, 0.0  ;;  %v1543_v24 = vadd.f32 %v1511_v27, %v1443_v19  ;;  %v872_v59 = vmul.f32 0.16666667, %v840_v15  ;;  %v1178_v9 = vld [vmem:[#allocation2 + $0x1e9] sm:$0xff] }
 0x1cb   : > { %v839_v20 = vmin.f32 %v807_v62, 6.0  ;;  %v2113_v56 = vsel %vm338_vm0, %v3889_v58, 0.0  ;;  %v1014_v41 = vmul.f32 %v4259_v53, %v978_v18  ;;  %v1015_v30 = vmul.f32 %v4259_v53, %v979_v52  ;;  %v1581_v35 = vld [vmem:[#allocation2 + $0x227] sm:$0xff] }
 0x1cc   : > { %v1977_v61 = vmin.f32 %v1945_v17, 6.0  ;;  %v1978_v21 = vmin.f32 %v1946_v48, 6.0  ;;  %v1114_v1 = vmul.f32 %v4261_v63, %v1078_v2  ;;  %v1313_v38 = vmul.f32 %v4258_v29, %v979_v52  ;;  %v1582_v17 = vld [vmem:[#allocation2 + $0x22f] sm:$0xff] }
 0x1cd   : > { %v1613_v5 = vmul.f32 %v4220_v45, %v978_v18  ;;  %v1614_v0 = vmul.f32 %v4220_v45, %v979_v52  ;;  %v1344_v58 = vadd.f32 %v1312_v43, %v1244_v39  ;;  %v1713_v13 = vmul.f32 %v3002_v23, %v1078_v2  ;;  %v4265_v43 = vld [vmem:[#allocation16_spill] sm:$0xff] }
 0x1ce   : > { %v2009_v36 = vmul.f32 0.16666667, %v1977_v61  ;;  %v2010_v7 = vmul.f32 0.16666667, %v1978_v21  ;;  %v1412_v51 = vmul.f32 %v2983_v8, %v1078_v2  ;;  %v1813_v63 = vmul.f32 %v4219_v32, %v1178_v9 }
 0x1cf   : > { %v1645_v60 = vadd.f32 %v1613_v5, %v1542_v55  ;;  %v1646_v53 = vadd.f32 %v1614_v0, %v1543_v24  ;;  %v904_v33 = vmul.f32 %v872_v59, %v4253_v28  ;;  %v871_v26 = vmul.f32 0.16666667, %v839_v20 }
 0x1d0   : > { %v3960_v46 = vmul.f32 %v2009_v36, %v1881_v11  ;;  %v3962_v27 = vmul.f32 %v2010_v7, %v1882_v37  ;;  %v1413_v12 = vmul.f32 %v2983_v8, %v1079_v25  ;;  %v1345_v19 = vadd.f32 %v1313_v38, %v1245_v57  ;;  %v4266_v38 = vld [vmem:[#allocation21_spill] sm:$0xff]  ;;  %v4267_v7 = vld [vmem:[#allocation22_spill] sm:$0xff] }
 0x1d1   : > { %v1745_v15 = vadd.f32 %v1713_v13, %v1645_v60  ;;  %v1746_v62 = vadd.f32 %v1714_v14, %v1646_v53  ;;  %v1215_v10 = vmul.f32 %v4263_v42, %v1179_v22  ;;  %939 = vst.msk [vmem:[#allocation2 + $0x210] sm:$0xff] %vm338_vm0, %v904_v33  ;;  %v903_v11 = vmul.f32 %v871_v26, %v3906_v50 }
 0x1d2   : > { %2074 = vst.msk [vmem:[%s3125_s16 + $0xc0] sm:$0xff] %vm338_vm0, %v3960_v46  ;;  %2075 = vst.msk [vmem:[%s3125_s16 + $0xc8] sm:$0xff] %vm338_vm0, %v3962_v27  ;;  %v2114_v37 = vadd.f32 %v2113_v56, %v2112_v6  ;;  %v2115_v28 = vsel %vm338_vm0, %v3891_v44, 0.0  ;;  %v1146_v25 = vadd.f32 %v1114_v1, %v1014_v41  ;;  %v1214_v34 = vmul.f32 %v4263_v42, %v1178_v9 }
 0x1d3   : > { %v1845_v39 = vadd.f32 %v1813_v63, %v1745_v15  ;;  %v1846_v3 = vadd.f32 %v1814_v54, %v1746_v62  ;;  %v1147_v18 = vadd.f32 %v1115_v47, %v1015_v30  ;;  %v1444_v55 = vadd.f32 %v1412_v51, %v1344_v58  ;;  %938 = vst.msk [vmem:[#allocation2 + $0x208] sm:$0xff] %vm338_vm0, %v903_v11 }
 0x1d4   : > { %v1512_v14 = vmul.f32 %v2986_v4, %v1178_v9  ;;  %v2116_v48 = vadd.f32 %v2115_v28, %v2114_v37  ;;  %v1513_v50 = vmul.f32 %v2986_v4, %v1179_v22  ;;  %v1445_v6 = vadd.f32 %v1413_v12, %v1345_v19 }
 0x1d5   : > { %v1883_v52 = vadd.f32 %v3649_v49, %v1845_v39  ;;  %v1884_v44 = vadd.f32 %v3649_v49, %v1846_v3  ;;  %v3984_v42 = vmul.f32 %v4220_v45, %v1581_v35  ;;  %v3988_v57 = vmul.f32 %v4220_v45, %v1582_v17  ;;  %v1681_v3 = vld [vmem:[#allocation2 + $0x228] sm:$0xff]  ;;  %v1682_v35 = vld [vmem:[#allocation2 + $0x230] sm:$0xff] }
 0x1d6   : > { %v2118_v54 = vadd.f32 %v3923_v40, %v2116_v48  ;;  %v2119_v24 = vsel %vm338_vm0, %v4265_v43, 0.0  ;;  %v1246_v59 = vadd.f32 %v1214_v34, %v1146_v25  ;;  %v1544_v22 = vadd.f32 %v1512_v14, %v1444_v55 }
 0x1d7   : > { %v1915_v47 = vadd.f32 3.0, %v1883_v52  ;;  %v1916_v2 = vadd.f32 3.0, %v1884_v44  ;;  %v1247_v20 = vadd.f32 %v1215_v10, %v1147_v18  ;;  %v1545_v1 = vadd.f32 %v1513_v50, %v1445_v6  ;;  %v1782_v6 = vld [vmem:[#allocation2 + $0x231] sm:$0xff] }
 0x1d8   : > { %v2120_v56 = vadd.f32 %v2119_v24, %v2118_v54  ;;  %v1379_v41 = vld [vmem:[#allocation2 + $0x210] sm:$0xff]  ;;  %v2121_v40 = vsel %vm338_vm0, %v4266_v38, 0.0  ;;  %v2123_v9 = vsel %vm338_vm0, %v4267_v7, 0.0  ;;  %v1717_v54 = vmul.f32 %v3002_v23, %v1681_v3 }
 0x1d9   : > { %v1947_v61 = vmax.f32 %v1915_v47, 0.0  ;;  %v1948_v21 = vmax.f32 %v1916_v2, 0.0  ;;  %v1479_v30 = vld [vmem:[#allocation2 + $0x211] sm:$0xff]  ;;  %v1415_v5 = vmul.f32 %v2983_v8, %v1379_v41  ;;  %v1716_v36 = vmul.f32 %v3002_v23, %v1379_v41 }
 0x1da   : > { %v1515_v0 = vmul.f32 %v2986_v4, %v1479_v30  ;;  %v1816_v51 = vmul.f32 %v4219_v32, %v1479_v30  ;;  %v1278_v60 = vld [vmem:[#allocation2 + $0x207] sm:$0xff]  ;;  %v1279_v53 = vld [vmem:[#allocation2 + $0x20f] sm:$0xff]  ;;  %v2122_v33 = vadd.f32 %v2121_v40, %v2120_v56  ;;  %v1718_v47 = vmul.f32 %v3002_v23, %v1682_v35 }
 0x1db   : > { %v1979_v58 = vmin.f32 %v1947_v61, 6.0  ;;  %v1980_v13 = vmin.f32 %v1948_v21, 6.0  ;;  %v1378_v63 = vld [vmem:[#allocation2 + $0x208] sm:$0xff]  ;;  %v1314_v26 = vmul.f32 %v4258_v29, %v1278_v60  ;;  %v1315_v12 = vmul.f32 %v4258_v29, %v1279_v53 }
 0x1dc   : > { %v1414_v19 = vmul.f32 %v2983_v8, %v1378_v63  ;;  %v1478_v15 = vld [vmem:[#allocation2 + $0x209] sm:$0xff]  ;;  %v1615_v62 = vmul.f32 %v4220_v45, %v1278_v60  ;;  %v1616_v28 = vmul.f32 %v4220_v45, %v1279_v53  ;;  %v1715_v29 = vmul.f32 %v3002_v23, %v1378_v63 }
 0x1dd   : > { %v2011_v10 = vmul.f32 0.16666667, %v1979_v58  ;;  %v2012_v11 = vmul.f32 0.16666667, %v1980_v13  ;;  %v1514_v37 = vmul.f32 %v2986_v4, %v1478_v15  ;;  %v1346_v25 = vadd.f32 %v1314_v26, %v1246_v59  ;;  %v1781_v4 = vld [vmem:[#allocation2 + $0x229] sm:$0xff] }
 0x1de   : > { %v1347_v34 = vadd.f32 %v1315_v12, %v1247_v20  ;;  %v1647_v39 = vadd.f32 %v1615_v62, %v1544_v22  ;;  %v1648_v55 = vadd.f32 %v1616_v28, %v1545_v1  ;;  %v1815_v14 = vmul.f32 %v4219_v32, %v1478_v15 }
 0x1df   : > { %v2043_v18 = vmul.f32 %v2011_v10, %v1883_v52  ;;  %v2044_v8 = vmul.f32 %v2012_v11, %v1884_v44  ;;  %v1446_v17 = vadd.f32 %v1414_v19, %v1346_v25  ;;  %v2124_v45 = vadd.f32 %v2123_v9, %v2122_v33 }
 0x1e0   : > { %v1447_v48 = vadd.f32 %v1415_v5, %v1347_v34  ;;  %v1747_v50 = vadd.f32 %v1715_v29, %v1647_v39  ;;  %v1748_v2 = vadd.f32 %v1716_v36, %v1648_v55  ;;  %v2125_v52 = vsel %vm338_vm0, %v3828_v16, 0.0 }
 0x1e1   : > { %2076 = vst.msk [vmem:[%s3125_s16 + $0xd0] sm:$0xff] %vm338_vm0, %v2043_v18  ;;  %2077 = vst.msk [vmem:[%s3125_s16 + $0xd8] sm:$0xff] %vm338_vm0, %v2044_v8  ;;  %v1546_v44 = vadd.f32 %v1514_v37, %v1446_v17  ;;  %v2126_v59 = vadd.f32 %v2125_v52, %v2124_v45  ;;  %v1817_v22 = vmul.f32 %v4219_v32, %v1781_v4  ;;  %v2127_v61 = vsel %vm338_vm0, %v3832_v31, 0.0 }
 0x1e2   : > { %v1547_v43 = vadd.f32 %v1515_v0, %v1447_v48  ;;  %v1847_v24 = vadd.f32 %v1815_v14, %v1747_v50  ;;  %v1818_v20 = vmul.f32 %v4219_v32, %v1782_v6  ;;  %v1848_v56 = vadd.f32 %v1816_v51, %v1748_v2 }
 0x1e3   : > { %v1649_v21 = vadd.f32 %v3984_v42, %v1546_v44  ;;  %v2128_v30 = vadd.f32 %v2127_v61, %v2126_v59  ;;  %v2129_v1 = vsel %vm338_vm0, %v3960_v46, 0.0  ;;  %v2131_v31 = vsel %vm338_vm0, %v3962_v27, 0.0 }
 0x1e4   : > { %v1650_v23 = vadd.f32 %v3988_v57, %v1547_v43  ;;  %v1885_v41 = vadd.f32 %v3649_v49, %v1847_v24  ;;  %v1886_v16 = vadd.f32 %v3649_v49, %v1848_v56  ;;  %v2133_v58 = vsel %vm338_vm0, %v2043_v18, 0.0 }
 0x1e5   : > { %v1749_v38 = vadd.f32 %v1717_v54, %v1649_v21  ;;  %v2130_v32 = vadd.f32 %v2129_v1, %v2128_v30  ;;  %v2135_v26 = vsel %vm338_vm0, %v2044_v8, 0.0 }
 0x1e6   : > { %v1750_v40 = vadd.f32 %v1718_v47, %v1650_v23  ;;  %v1917_v5 = vadd.f32 3.0, %v1885_v41  ;;  %v1918_v0 = vadd.f32 3.0, %v1886_v16 }
 0x1e7   : > { %v1849_v36 = vadd.f32 %v1817_v22, %v1749_v38  ;;  %v2132_v57 = vadd.f32 %v2131_v31, %v2130_v32 }
 0x1e8   : > { %v1850_v42 = vadd.f32 %v1818_v20, %v1750_v40  ;;  %v1949_v7 = vmax.f32 %v1917_v5, 0.0  ;;  %v1950_v9 = vmax.f32 %v1918_v0, 0.0 }
 0x1e9   : > { %v1887_v13 = vadd.f32 %v3649_v49, %v1849_v36  ;;  %v2134_v60 = vadd.f32 %v2133_v58, %v2132_v57 }
 0x1ea   : > { %v1888_v51 = vadd.f32 %v3649_v49, %v1850_v42  ;;  %v1981_v46 = vmin.f32 %v1949_v7, 6.0  ;;  %v1982_v53 = vmin.f32 %v1950_v9, 6.0 }
 0x1eb   : > { %v1919_v63 = vadd.f32 3.0, %v1887_v13  ;;  %v2136_v19 = vadd.f32 %v2135_v26, %v2134_v60 }
 0x1ec   : > { %v1920_v27 = vadd.f32 3.0, %v1888_v51  ;;  %v2013_v33 = vmul.f32 0.16666667, %v1981_v46  ;;  %v2014_v12 = vmul.f32 0.16666667, %v1982_v53 }
 0x1ed   : > { %v1951_v15 = vmax.f32 %v1919_v63, 0.0 }
 0x1ee   : > { %v1952_v62 = vmax.f32 %v1920_v27, 0.0  ;;  %v2045_v10 = vmul.f32 %v2013_v33, %v1885_v41  ;;  %v2046_v11 = vmul.f32 %v2014_v12, %v1886_v16 }
 0x1ef   : > { %v1983_v37 = vmin.f32 %v1951_v15, 6.0 }
 0x1f0   : > { %v1984_v49 = vmin.f32 %v1952_v62, 6.0  ;;  %2078 = vst.msk [vmem:[%s3125_s16 + $0xe0] sm:$0xff] %vm338_vm0, %v2045_v10  ;;  %v2137_v28 = vsel %vm338_vm0, %v2045_v10, 0.0  ;;  %2079 = vst.msk [vmem:[%s3125_s16 + $0xe8] sm:$0xff] %vm338_vm0, %v2046_v11  ;;  %v2139_v3 = vsel %vm338_vm0, %v2046_v11, 0.0 }
 0x1f1   : > { %v2138_v25 = vadd.f32 %v2137_v28, %v2136_v19  ;;  %v2015_v34 = vmul.f32 0.16666667, %v1983_v37 }
 0x1f2   : > { %v2016_v39 = vmul.f32 0.16666667, %v1984_v49 }
 0x1f3   : > { %v2140_v35 = vadd.f32 %v2139_v3, %v2138_v25  ;;  %v2047_v29 = vmul.f32 %v2015_v34, %v1887_v13 }
 0x1f4   : > { %v2048_v18 = vmul.f32 %v2016_v39, %v1888_v51 }
 0x1f5   : > { %2080 = vst.msk [vmem:[%s3125_s16 + $0xf0] sm:$0xff] %vm338_vm0, %v2047_v29  ;;  %v2141_v8 = vsel %vm338_vm0, %v2047_v29, 0.0 }
 0x1f6   : > { %2081 = vst.msk [vmem:[%s3125_s16 + $0xf8] sm:$0xff] %vm338_vm0, %v2048_v18 }
 0x1f7   : > { %2561 = shalt.err (!%p2558_p5)
}
 0x1f8   : > { %s2562_s16 = scalar_lea.hbm %s4043_s12, 4096  ;;  %s2566_s8 = scalar_lea.hbm %s4138_s5, 8192 }
 0x1f9   : > { %p2563_p6 = scmp.ne.s32.totalorder %s4043_s12, %s2562_s16  ;;  %p2567_p10 = scmp.lt.u32.totalorder %s4043_s12, %s4138_s5 }
 0x1fa   : > { %p2568_p11 = scmp.lt.u32.totalorder %s2566_s8, %s2562_s16  ;;  %p2570_p13 = scmp.lt.u32.totalorder %s2562_s16, %s4043_s12 }
 0x1fb   : > { %p2564_p7 = pnand %p2563_p6, %p2740_p4 }
 0x1fc   : > { %p2569_p12 = por %p2568_p11, %p2567_p10 }
 0x1fd   : > { %p2565_p9 = pneg %p2564_p7 }
 0x1fe   : > { %p2571_p0 = por %p2570_p13, %p2569_p12 }
 0x200   : > { %p2572_p1 = pnand %p2571_p0, %p2565_p9 }
 0x202   : > { %2575 = shalt.err (!%p2572_p1)
}
 0x203   : > { %s2662_s15 = smov 128   ;;  %s2663_s18 = smov 8   ;;  %v2142_v55 = vadd.f32 %v2141_v8, %v2140_v35  ;;  %v2143_v14 = vsel %vm338_vm0, %v2048_v18, 0.0  ;;  %v2151_v54 = vld [vmem:[%s3938_s27] sm:$0x1] }
 0x204   : > { %2483 = dma.vmem_to_hbm [thread:$0]  (%p2740_p4), %s4045_s30, 4096, %s4043_s12, %s2155_s13, %s2662_s15, %s2662_s15, %s2663_s18  }
 0x205   : > { %v2144_v17 = vadd.f32 %v2143_v14, %v2142_v55  ;;  %s2393_s19 = sshll.u32 %s2650_s24, 4  ;;  %s2190_s16 = sshll.u32 %s3938_s27, 4  ;;  %s4085_s16 = int_to_ptr.vmem [resolvable:$true] %s2190_s16 }
 0x206   : > { %s4083_s30 = scalar_lea.hbm %s4139_s6, %s2393_s19  ;;  %s2160_s12 = scalar_lea.sflag [#allocation6], %s3101_s14 }
 0x207   : > { %v2145_v48 = vrot.slane %v2144_v17, 4  ;;  %s2576_s13 = scalar_lea.vmem %s4085_s16, 16  ;;  %s2664_s24 = smov [#allocation5]  }
 0x208   : > { %p2577_p2 = scmp.ne.s32.totalorder %s4085_s16, %s2576_s13  ;;  %s2580_s8 = sshll.u32 %s2664_s24, 4  ;;  %s2581_s8 = int_to_ptr.vmem [resolvable:$false] %s2580_s8 }
 0x209   : > { %v2146_v50 = vadd.f32 %v2145_v48, %v2144_v17  ;;  %s2582_s11 = scalar_lea.vmem %s2581_s8, 32  ;;  %p2583_p6 = scmp.lt.s32.totalorder %s4085_s16, %s2581_s8 }
 0x20a   : > { %p2578_p3 = pnand %p2577_p2, %p2740_p4  ;;  %p2584_p7 = scmp.lt.s32.totalorder %s2582_s11, %s2576_s13 }
 0x20b   : > { %v2147_v4 = vrot.slane %v2146_v50, 2 }
 0x20c   : > { %p2579_p5 = pneg %p2578_p3  ;;  %p2585_p9 = por %p2584_p7, %p2583_p6 }
 0x20d   : > { %v2148_v6 = vadd.f32 %v2147_v4, %v2146_v50 }
 0x20e   : > { %p2586_p10 = pnand %p2585_p9, %p2579_p5 }
 0x20f   : > { %v2149_v45 = vrot.slane %v2148_v6, 1 }
 0x211   : > { %v2150_v47 = vadd.f32 %v2149_v45, %v2148_v6 }
 0x213   : > { %v2152_v2 = vadd.f32 %v2151_v54, %v2150_v47 }
 0x215   : > { %2153 = vst.msk [vmem:[%s3938_s27] sm:$0x1] %vm944_vm2, %v2152_v2 }
 0x216   : > { %2589 = shalt.err (!%p2586_p10)
}
 0x217   : > { %s2590_s14 = scalar_lea.hbm %s4083_s30, 16  ;;  %s2594_s15 = scalar_lea.hbm %s4139_s6, 32 }
 0x218   : > { %p2591_p11 = scmp.ne.s32.totalorder %s4083_s30, %s2590_s14  ;;  %p2595_p0 = scmp.lt.u32.totalorder %s4083_s30, %s4139_s6 }
 0x219   : > { %p2596_p1 = scmp.lt.u32.totalorder %s2594_s15, %s2590_s14  ;;  %p2598_p3 = scmp.lt.u32.totalorder %s2590_s14, %s4083_s30 }
 0x21a   : > { %p2592_p12 = pnand %p2591_p11, %p2740_p4 }
 0x21b   : > { %p2597_p2 = por %p2596_p1, %p2595_p0 }
 0x21c   : > { %p2593_p13 = pneg %p2592_p12 }
 0x21d   : > { %p2599_p5 = por %p2598_p3, %p2597_p2 }
 0x21f   : > { %p2600_p6 = pnand %p2599_p5, %p2593_p13 }
 0x221   : > { %2603 = shalt.err (!%p2600_p6)
}
 0x222   : > { %2484 = dma.vmem_to_hbm [thread:$0]  (%p2740_p4), %s4085_s16, 16, %s4083_s30, %s2160_s12  }
 0x223 PF: > { %p2494_p7 = scmp.ge.s32.totalorder %s2658_s26, 2  ;;  %s2202_s20 = sand.u32 1, %s2638_s21  }
 0x224   : > { %s2203_s28 = scalar_lea.sflag [#allocation4], %s2202_s20 }
 0x225   : > { %p2488_p9 = pnand %p2494_p7, %p2747_p8 }
 0x227   : > { %2629 = dma.done.wait (!%p2488_p9), %s2203_s28, 4096  }
 0x228   : > { %2631 = vsyncadd (!%p2488_p9), %s2203_s28, 4294963200  ;;  %s2212_s13 = scalar_lea.sflag [#allocation6], %s2202_s20 }
 0x229   : > { %2633 = dma.done.wait (!%p2488_p9), %s2212_s13, 16  }
 0x22a   : > { %2635 = vsyncadd (!%p2488_p9), %s2212_s13, 4294967280  ;;  %s23_s26 = sadd.s32 1, %s2658_s26   ;;  %s4268_s21 = smov %s2642_s22 }
 0x22b   : > { %p20_p10 = scmp.ge.s32.totalorder %s23_s26, 4   ;;  %s4269_s22 = smov %s2646_s23 }
 0x22c   : > { %s4270_s23 = smov %s2753_s10  ;;  %s4271_s24 = smov %s2654_s25 }
 0x22d   : > { %s4272_s25 = smov %s4274_s29  ;;  %22 = sbr.rel (!%p20_p10) target bundleno = 6 (0x6), region = 111 }
 0x234   :  { %2216 = vsyncpa [#allocation4], 1 }
 0x235   :  { %2218 = vsyncpa [#allocation4 + $0x1], 1 }
 0x236   :  { %2219 = vsyncpa [#allocation6], 1 }
 0x237   :  { %2221 = vsyncpa [#allocation6 + $0x1], 1 }

</bundles_post_ra>
